<compile_context>
chip_gen: v6e
topology: v6e:2x2x1
jax: 0.10.0
libtpu: 0.0.40
codegen_flags: <defaults>
</compile_context>

<pallas_src>
import functools
import math

import jax
import jax.numpy as jnp
from jax.experimental import pallas as pl
from jax.experimental.pallas import tpu as pltpu


def _round_up(x: int, m: int) -> int:
    return ((x + m - 1) // m) * m


def _freq_enc_kernel(freqs_ref, x_ref, out_ref, *, in_dim, num_freq, include_input):
    # freqs_ref: (1, F); x_ref: (TN, in_dim); out_ref: (TN, out_dim)
    x = x_ref[...]                                   # (TN, in_dim)
    freqs = freqs_ref[...]                           # (1, F)
    # Match the reference op order exactly: (2*pi*x) first, then * freqs (all VPU, no MXU).
    x2pi = x * jnp.float32(2.0 * math.pi)
    half_pi = jnp.float32(math.pi / 2.0)
    dF = in_dim * num_freq
    for d in range(in_dim):                          # in_dim is tiny (e.g. 4): static unrolled
        seg = x2pi[:, d:d + 1] * freqs               # (TN, F) lane-broadcast multiply
        out_ref[:, d * num_freq:(d + 1) * num_freq] = jnp.sin(seg)
        out_ref[:, dF + d * num_freq: dF + (d + 1) * num_freq] = jnp.sin(seg + half_pi)
    if include_input:
        out_ref[:, 2 * dF: 2 * dF + in_dim] = x
    # No lane padding in the output array -> nothing to zero-fill.


def frequency_encoding(in_tensor, *, num_frequencies, include_input=True, tile_rows=8192):
    """Pallas TPU implementation of FrequencyEncoding.forward (apply_perturbation=False)."""
    in_tensor = jnp.asarray(in_tensor, jnp.float32)
    *lead, in_dim = in_tensor.shape
    F = int(num_frequencies)
    out_dim = in_dim * F * 2 + (in_dim if include_input else 0)

    # freqs = logspace(0, log2(F), steps=F, base=2) -- same expression as the torch module.
    freqs = jnp.exp2(jnp.linspace(0.0, math.log2(F), F)).astype(jnp.float32).reshape(1, F)

    # Flatten leading dims to rows (no padding; Pallas clips the boundary block).
    n = 1
    for s in lead:
        n *= int(s)
    n = max(n, 1)
    x_flat = in_tensor.reshape(n, in_dim)

    # Row tile: big enough to amortize per-grid-step overhead, capped by VMEM capacity
    # (generation-aware: v7x has 64 MiB/TC, v5e/v6e 128 MiB) and by the problem size.
    bytes_per_row = 2 * 4 * (out_dim + in_dim)          # double-buffered in+out, f32
    try:
        vmem_cap = int(pltpu.get_tpu_info().vmem_capacity_bytes)
    except Exception:
        vmem_cap = 64 * 1024 * 1024
    cap_rows = max(8, (vmem_cap // 4) // bytes_per_row)
    tile = min(int(tile_rows), cap_rows, _round_up(n, 8))
    tile = max(8, (tile // 8) * 8)

    grid = (pl.cdiv(n, tile),)
    vmem_limit = int(min(48 * 1024 * 1024,
                         max(16 * 1024 * 1024, 4 * tile * (out_dim + in_dim) * 4)))

    kernel = functools.partial(
        _freq_enc_kernel, in_dim=in_dim, num_freq=F, include_input=include_input)

    out_flat = pl.pallas_call(
        kernel,
        out_shape=jax.ShapeDtypeStruct((n, out_dim), jnp.float32),
        grid=grid,
        in_specs=[
            pl.BlockSpec((1, F), lambda i: (0, 0)),          # freqs: resident, fetched once
            pl.BlockSpec((tile, in_dim), lambda i: (i, 0)),  # x rows
        ],
        out_specs=pl.BlockSpec((tile, out_dim), lambda i: (i, 0)),  # exact width, no pad
        compiler_params=pltpu.CompilerParams(
            # Rows are embarrassingly parallel; on v7x this lets both TCs share the grid.
            dimension_semantics=("parallel",),
            vmem_limit_bytes=vmem_limit,
        ),
    )(freqs, x_flat)

    return out_flat.reshape(*lead, out_dim)


def _reference(in_tensor, num_frequencies, include_input=True):
    """Pure-JAX reference mirroring the PyTorch forward (apply_perturbation=False)."""
    x = jnp.asarray(in_tensor, jnp.float32)
    F = num_frequencies
    freqs = jnp.exp2(jnp.linspace(0.0, math.log2(F), F)).astype(jnp.float32)
    scaled = (2.0 * math.pi * x)[..., None] * freqs            # (..., in_dim, F)
    scaled = scaled.reshape(*scaled.shape[:-2], -1)            # (..., in_dim*F)
    enc = jnp.sin(jnp.concatenate([scaled, scaled + math.pi / 2.0], axis=-1))
    if include_input:
        enc = jnp.concatenate([enc, x], axis=-1)
    return enc


if __name__ == "__main__":
    # TODO(synk): apply_perturbation=True (torch.randn_like noise) is not implemented;
    # the module's default forward path (apply_perturbation=False) is what the kernel covers.
    in_dim = 4
    num_frequencies = 6
    include_input = True
    out_dim = in_dim * num_frequencies * 2 + (in_dim if include_input else 0)

    # Tolerance note: arguments reach ~2*pi*F*|x| (~150 rad for normal inputs); f32
    # argument rounding alone contributes ~|arg|*eps ~ 2e-5 absolute noise in sin/cos,
    # so 2e-4 is a safe bound that still catches any real (O(1)) functional error.
    ATOL, RTOL = 2e-4, 1e-4

    key = jax.random.PRNGKey(0)
    k1, k2, k3 = jax.random.split(key, 3)

    # 1) Small example matching the module usage: batch=2, seq=8, in_dim=4.
    x_small = jax.random.normal(k1, (2, 8, in_dim), dtype=jnp.float32)
    out_small = frequency_encoding(
        x_small, num_frequencies=num_frequencies, include_input=include_input)
    out_small = jax.block_until_ready(out_small)
    ref_small = _reference(x_small, num_frequencies, include_input)
    assert out_small.shape == (2, 8, out_dim), out_small.shape
    assert jnp.allclose(out_small, ref_small, atol=ATOL, rtol=RTOL), float(
        jnp.max(jnp.abs(out_small - ref_small)))

    # 2) Larger, non-multiple row count (2112 rows) with the default big tile.
    x_big = jax.random.normal(k2, (64, 33, in_dim), dtype=jnp.float32)
    out_big = frequency_encoding(
        x_big, num_frequencies=num_frequencies, include_input=include_input)
    out_big = jax.block_until_ready(out_big)
    ref_big = _reference(x_big, num_frequencies, include_input)
    assert out_big.shape == (64, 33, out_dim), out_big.shape
    assert jnp.allclose(out_big, ref_big, atol=ATOL, rtol=RTOL), float(
        jnp.max(jnp.abs(out_big - ref_big)))

    # 3) Ragged row count with a small tile to exercise the multi-step grid and the
    #    clipped (partially out-of-bounds) boundary block.
    x_rag = jax.random.normal(k3, (7, 37, in_dim), dtype=jnp.float32)
    out_rag = frequency_encoding(
        x_rag, num_frequencies=num_frequencies, include_input=include_input,
        tile_rows=128)
    out_rag = jax.block_until_ready(out_rag)
    ref_rag = _reference(x_rag, num_frequencies, include_input)
    assert out_rag.shape == (7, 37, out_dim), out_rag.shape
    assert jnp.allclose(out_rag, ref_rag, atol=ATOL, rtol=RTOL), float(
        jnp.max(jnp.abs(out_rag - ref_rag)))

    print("KERNEL_OK")
</pallas_src>

<mosaic_0001>
module attributes {stable_mosaic.version = 11 : i64} {
  func.func @_freq_enc_kernel(%arg0: i32, %arg1: memref<1x6xf32, #tpu.memory_space<vmem>>, %arg2: memref<16x4xf32, #tpu.memory_space<vmem>>, %arg3: memref<16x52xf32, #tpu.memory_space<vmem>>) attributes {dimension_semantics = [#tpu.dimension_semantics<parallel>], iteration_bounds = array<i64: 1>, scalar_prefetch = 0 : i64, scratch_operands = 0 : i64, tpu.core_type = #tpu.core_type<tc>, window_params = [{pipeline_mode = #tpu.pipeline_mode<synchronous>, transform_indices = @transform_0, window_bounds = array<i64: 1, 6>}, {transform_indices = @transform_1, window_bounds = array<i64: 16, 4>}, {transform_indices = @transform_2, window_bounds = array<i64: 16, 52>}]} {
    %c0 = arith.constant 0 : index
    %c0_0 = arith.constant 0 : index
    %0 = vector.load %arg2[%c0, %c0_0] : memref<16x4xf32, #tpu.memory_space<vmem>>, vector<16x4xf32>
    %c0_1 = arith.constant 0 : index
    %c0_2 = arith.constant 0 : index
    %1 = vector.load %arg1[%c0_1, %c0_2] : memref<1x6xf32, #tpu.memory_space<vmem>>, vector<1x6xf32>
    %cst = arith.constant 6.28318548 : f32
    %2 = vector.broadcast %cst : f32 to vector<16x4xf32>
    %3 = arith.mulf %0, %2 : vector<16x4xf32>
    %4 = vector.extract_strided_slice %3 {offsets = [0, 0], sizes = [16, 1], strides = [1, 1]} : vector<16x4xf32> to vector<16x1xf32>
    %5 = vector.broadcast %4 : vector<16x1xf32> to vector<16x6xf32>
    %6 = vector.broadcast %1 : vector<1x6xf32> to vector<16x6xf32>
    %7 = arith.mulf %5, %6 : vector<16x6xf32>
    %8 = math.sin %7 : vector<16x6xf32>
    %c0_3 = arith.constant 0 : index
    %c0_4 = arith.constant 0 : index
    %9 = vector.load %arg3[%c0_3, %c0_4] : memref<16x52xf32, #tpu.memory_space<vmem>>, vector<16x6xf32>
    tpu.vector_store %arg3[%c0_3, %c0_4], %8 {strides = array<i32>} : memref<16x52xf32, #tpu.memory_space<vmem>>, vector<16x6xf32>,
    %cst_5 = arith.constant 1.57079637 : f32
    %10 = vector.broadcast %cst_5 : f32 to vector<16x6xf32>
    %11 = arith.addf %7, %10 : vector<16x6xf32>
    %12 = math.sin %11 : vector<16x6xf32>
    %c0_6 = arith.constant 0 : index
    %c24 = arith.constant 24 : index
    %13 = vector.load %arg3[%c0_6, %c24] : memref<16x52xf32, #tpu.memory_space<vmem>>, vector<16x6xf32>
    tpu.vector_store %arg3[%c0_6, %c24], %12 {strides = array<i32>} : memref<16x52xf32, #tpu.memory_space<vmem>>, vector<16x6xf32>,
    %14 = vector.extract_strided_slice %3 {offsets = [0, 1], sizes = [16, 1], strides = [1, 1]} : vector<16x4xf32> to vector<16x1xf32>
    %15 = vector.broadcast %14 : vector<16x1xf32> to vector<16x6xf32>
    %16 = vector.broadcast %1 : vector<1x6xf32> to vector<16x6xf32>
    %17 = arith.mulf %15, %16 : vector<16x6xf32>
    %18 = math.sin %17 : vector<16x6xf32>
    %c0_7 = arith.constant 0 : index
    %c6 = arith.constant 6 : index
    %19 = vector.load %arg3[%c0_7, %c6] : memref<16x52xf32, #tpu.memory_space<vmem>>, vector<16x6xf32>
    tpu.vector_store %arg3[%c0_7, %c6], %18 {strides = array<i32>} : memref<16x52xf32, #tpu.memory_space<vmem>>, vector<16x6xf32>,
    %cst_8 = arith.constant 1.57079637 : f32
    %20 = vector.broadcast %cst_8 : f32 to vector<16x6xf32>
    %21 = arith.addf %17, %20 : vector<16x6xf32>
    %22 = math.sin %21 : vector<16x6xf32>
    %c0_9 = arith.constant 0 : index
    %c30 = arith.constant 30 : index
    %23 = vector.load %arg3[%c0_9, %c30] : memref<16x52xf32, #tpu.memory_space<vmem>>, vector<16x6xf32>
    tpu.vector_store %arg3[%c0_9, %c30], %22 {strides = array<i32>} : memref<16x52xf32, #tpu.memory_space<vmem>>, vector<16x6xf32>,
    %24 = vector.extract_strided_slice %3 {offsets = [0, 2], sizes = [16, 1], strides = [1, 1]} : vector<16x4xf32> to vector<16x1xf32>
    %25 = vector.broadcast %24 : vector<16x1xf32> to vector<16x6xf32>
    %26 = vector.broadcast %1 : vector<1x6xf32> to vector<16x6xf32>
    %27 = arith.mulf %25, %26 : vector<16x6xf32>
    %28 = math.sin %27 : vector<16x6xf32>
    %c0_10 = arith.constant 0 : index
    %c12 = arith.constant 12 : index
    %29 = vector.load %arg3[%c0_10, %c12] : memref<16x52xf32, #tpu.memory_space<vmem>>, vector<16x6xf32>
    tpu.vector_store %arg3[%c0_10, %c12], %28 {strides = array<i32>} : memref<16x52xf32, #tpu.memory_space<vmem>>, vector<16x6xf32>,
    %cst_11 = arith.constant 1.57079637 : f32
    %30 = vector.broadcast %cst_11 : f32 to vector<16x6xf32>
    %31 = arith.addf %27, %30 : vector<16x6xf32>
    %32 = math.sin %31 : vector<16x6xf32>
    %c0_12 = arith.constant 0 : index
    %c36 = arith.constant 36 : index
    %33 = vector.load %arg3[%c0_12, %c36] : memref<16x52xf32, #tpu.memory_space<vmem>>, vector<16x6xf32>
    tpu.vector_store %arg3[%c0_12, %c36], %32 {strides = array<i32>} : memref<16x52xf32, #tpu.memory_space<vmem>>, vector<16x6xf32>,
    %34 = vector.extract_strided_slice %3 {offsets = [0, 3], sizes = [16, 1], strides = [1, 1]} : vector<16x4xf32> to vector<16x1xf32>
    %35 = vector.broadcast %34 : vector<16x1xf32> to vector<16x6xf32>
    %36 = vector.broadcast %1 : vector<1x6xf32> to vector<16x6xf32>
    %37 = arith.mulf %35, %36 : vector<16x6xf32>
    %38 = math.sin %37 : vector<16x6xf32>
    %c0_13 = arith.constant 0 : index
    %c18 = arith.constant 18 : index
    %39 = vector.load %arg3[%c0_13, %c18] : memref<16x52xf32, #tpu.memory_space<vmem>>, vector<16x6xf32>
    tpu.vector_store %arg3[%c0_13, %c18], %38 {strides = array<i32>} : memref<16x52xf32, #tpu.memory_space<vmem>>, vector<16x6xf32>,
    %cst_14 = arith.constant 1.57079637 : f32
    %40 = vector.broadcast %cst_14 : f32 to vector<16x6xf32>
    %41 = arith.addf %37, %40 : vector<16x6xf32>
    %42 = math.sin %41 : vector<16x6xf32>
    %c0_15 = arith.constant 0 : index
    %c42 = arith.constant 42 : index
    %43 = vector.load %arg3[%c0_15, %c42] : memref<16x52xf32, #tpu.memory_space<vmem>>, vector<16x6xf32>
    tpu.vector_store %arg3[%c0_15, %c42], %42 {strides = array<i32>} : memref<16x52xf32, #tpu.memory_space<vmem>>, vector<16x6xf32>,
    %c0_16 = arith.constant 0 : index
    %c48 = arith.constant 48 : index
    %44 = vector.load %arg3[%c0_16, %c48] : memref<16x52xf32, #tpu.memory_space<vmem>>, vector<16x4xf32>
    tpu.vector_store %arg3[%c0_16, %c48], %0 {strides = array<i32>} : memref<16x52xf32, #tpu.memory_space<vmem>>, vector<16x4xf32>,
    return
  }
  func.func @transform_0(%arg0: i32) -> (i32, i32) {
    %c0_i32 = arith.constant 0 : i32
    %c0_i32_0 = arith.constant 0 : i32
    %c0_i32_1 = arith.constant 0 : i32
    return %c0_i32, %c0_i32_0 : i32, i32
  }
  func.func @transform_1(%arg0: i32) -> (i32, i32) {
    %c0_i32 = arith.constant 0 : i32
    %c0_i32_0 = arith.constant 0 : i32
    return %arg0, %c0_i32 : i32, i32
  }
  func.func @transform_2(%arg0: i32) -> (i32, i32) {
    %c0_i32 = arith.constant 0 : i32
    %c0_i32_0 = arith.constant 0 : i32
    return %arg0, %c0_i32 : i32, i32
  }
}

</mosaic_0001>

<bundles_post_ra>
// kernel: tpu_custom_call.1
= control target key start
LH: loop header
LB: loop body
LE: loop exit
PB: predicated region body
PF: predicated region fallthrough
CT: control target
= control target key end

     0   :  { %v2088_v2 = vmov 1   ;;  %v2089_v3 = vmov 0   ;;  %s3718_s0 = inlined_call_operand.vmem [shape: f32[1,6], index: 0, kind: input, shape index: {}]   ;;  %s3719_s1 = inlined_call_operand.vmem [shape: f32[16,4], index: 1, kind: input, shape index: {}]   ;;  %s3720_s2 = inlined_call_operand.hbm [shape: f32[16,52], index: 2, kind: output, shape index: {}]  }
   0x1   :  { %v12_v0 = vld [vmem:[%s3719_s1] sm:$0xff]  ;;  %v13_v1 = vld [vmem:[%s3719_s1 + $0x8] sm:$0xff]  ;;  %1995 = vset.pattern.permute.xlu1 %v2088_v2  ;;  %1994 = vset.pattern.permute.xlu0 %v2089_v3 }
   0x2   :  { %v15_v4 = vmul.f32 6.2831855, %v12_v0 }
   0x3   :  { %7 = vsyncpa [#allocation3], 0  ;;  %v16_v5 = vmul.f32 6.2831855, %v13_v1  ;;  %v2090_v6 = vmov 2   ;;  %v2091_v7 = vmov 3  }
   0x4   :  { %468 = vperm.xlu1 %1995, %v15_v4   ;;  %19 = vperm.xlu0 %1994, %v15_v4   ;;  %v2133_v8 = vld [vmem:[%s3718_s0] ss:$0 sm:$0xff]  ;;  %v2092_v49 = vmov 2475754826   ;;  %v2093_v51 = vmov 2131351028  }
   0x5   :  { %v2094_v57 = vmov 2102212464   ;;  %v2095_v60 = vmov 683565275   ;;  %v2096_v0 = vmov 920167782  }
   0x6   :  { %s2098_s0 = smov 6   ;;  %s2099_s15 = smov 12  }
   0x7   :  { %s2100_s16 = smov 18   ;;  %s2101_s17 = smov 30  }
   0x8   :  { %472 = vperm.xlu1 %1995, %v16_v5   ;;  %24 = vperm.xlu0 %1994, %v16_v5   ;;  %s2102_s18 = smov 24   ;;  %s2103_s19 = smov 36  }
   0x9   :  { %s2104_s20 = smov 42   ;;  %s2105_s23 = smov 48  }
   0xc   :  { %1997 = vset.pattern.permute.xlu1 %v2090_v6  ;;  %1996 = vset.pattern.permute.xlu0 %v2090_v6  ;;  %v2097_v6 = vmov 1326507024  }
   0xd   :  { %922 = vperm.xlu1 %1997, %v16_v5   ;;  %918 = vperm.xlu0 %1996, %v15_v4  }
  0x11   :  { %1998 = vset.pattern.permute.xlu1 %v2091_v7  ;;  %1999 = vset.pattern.permute.xlu0 %v2091_v7 }
  0x12   :  { %1368 = vperm.xlu1 %1998, %v15_v4   ;;  %1372 = vperm.xlu0 %1999, %v16_v5  }
  0x7f   :  { %v469_v9 = vpop.permute.xlu1 %468  ;;  %v20_v10 = vpop.permute.xlu0 %19 }
  0x80   :  { %v2136_v11 = vmul.f32 %v2133_v8, %v469_v9  ;;  %v2139_v12 = vmul.f32 %v2133_v8, %v20_v10 }
  0x82   :  { %v480_v13 = vand.u32 2139095040, %v2136_v11  ;;  %v477_v28 = vand.u32 2147483647, %v2136_v11  ;;  %v38_v32 = vand.u32 2139095040, %v2139_v12  ;;  %v2163_v43 = vadd.f32 1.5707964, %v2136_v11 }
  0x83   :  { %v473_v14 = vpop.permute.xlu1 %472  ;;  %v25_v15 = vpop.permute.xlu0 %24  ;;  %vm479_vm13 = vcmp.lt.s32.totalorder %v2136_v11, 0 }
  0x84   :  { %v481_v16 = vshrl.u32 %v480_v13, 23  ;;  %v2143_v17 = vmul.f32 %v2133_v8, %v473_v14  ;;  %v2146_v18 = vmul.f32 %v2133_v8, %v25_v15  ;;  %v484_v35 = vand.u32 8388607, %v477_v28 }
  0x85   :  { %v39_v38 = vshrl.u32 %v38_v32, 23  ;;  %vm2272_vm14 = vcmp.le.f32.partialorder %v477_v28, 0.7853982 }
  0x86   :  { %v1861_v19 = vadd.s32 4294967169, %v481_v16  ;;  %v584_v20 = vand.u32 2139095040, %v2143_v17  ;;  %v142_v39 = vand.u32 2139095040, %v2146_v18  ;;  %v485_v42 = vor.u32 8388608, %v484_v35 }
  0x87   :  { %v2165_v44 = vadd.s32 4294967169, %v39_v38  ;;  %v581_v47 = vand.u32 2147483647, %v2143_v17 }
  0x88   :  { %v923_v21 = vpop.permute.xlu1 %922  ;;  %v487_v22 = vadd.s32 1, %v1861_v19  ;;  %v585_v25 = vshrl.u32 %v584_v20, 23  ;;  %v919_v27 = vpop.permute.xlu0 %918  ;;  %v2167_v45 = vshrl.u32 %v142_v39, 23  ;;  %v2172_v53 = vshll.u32 %v485_v42, 8 }
  0x89   :  { %v2150_v23 = vmul.f32 %v2133_v8, %v923_v21  ;;  %v2156_v33 = vmul.f32 %v2133_v8, %v919_v27 }
  0x8a   :  { %vm488_vm0 = vcmp.gt.s32.totalorder %v487_v22, 0  ;;  %v1865_v30 = vadd.s32 4294967169, %v585_v25 }
  0x8b   :  { %v1034_v24 = vand.u32 2139095040, %v2150_v23  ;;  %v489_v29 = vsel %vm488_vm0, %v487_v22, 0  ;;  %v930_v40 = vand.u32 2139095040, %v2156_v33 }
  0x8c   :  { %v491_v34 = vand.u32 31, %v489_v29  ;;  %v591_v36 = vadd.s32 1, %v1865_v30  ;;  %v490_v54 = vshrl.u32 %v489_v29, 5 }
  0x8d   :  { %v1035_v26 = vshrl.u32 %v1034_v24, 23  ;;  %v931_v46 = vshrl.u32 %v930_v40, 23  ;;  %v1369_v59 = vpop.permute.xlu1 %1368  ;;  %v1373_v4 = vpop.permute.xlu0 %1372 }
  0x8e   :  { %v492_v41 = vsub.s32 32, %v491_v34  ;;  %vm592_vm1 = vcmp.gt.s32.totalorder %v591_v36, 0  ;;  %v500_v56 = vshll.u32 %v2093_v51, %v491_v34  ;;  %v494_v61 = vshll.u32 %v2095_v60, %v491_v34 }
  0x8f   :  { %v1881_v31 = vadd.s32 4294967169, %v1035_v26  ;;  %v593_v48 = vsel %vm592_vm1, %v591_v36, 0  ;;  %v497_v62 = vshll.u32 %v2092_v49, %v491_v34  ;;  %v503_v63 = vshll.u32 %v2094_v57, %v491_v34 }
  0x90   :  { %v495_v50 = vshrl.u32 %v2092_v49, %v492_v41  ;;  %v498_v52 = vshrl.u32 %v2093_v51, %v492_v41  ;;  %v501_v58 = vshrl.u32 %v2094_v57, %v492_v41  ;;  %v504_v1 = vshrl.u32 %v2096_v0, %v492_v41 }
  0x91   :  { %v1041_v37 = vadd.s32 1, %v1881_v31  ;;  %v595_v2 = vand.u32 31, %v593_v48  ;;  %v1877_v3 = vadd.s32 4294967169, %v931_v46  ;;  %v507_v7 = vshrl.u32 %v2097_v6, %v492_v41 }
  0x92   :  { %v502_v5 = vor.u32 %v501_v58, %v500_v56  ;;  %v496_v9 = vor.u32 %v495_v50, %v494_v61  ;;  %v499_v10 = vor.u32 %v498_v52, %v497_v62  ;;  %v505_v13 = vor.u32 %v504_v1, %v503_v63 }
  0x93   :  { %vm1042_vm2 = vcmp.gt.s32.totalorder %v1041_v37, 0  ;;  %v506_v14 = vshll.u32 %v2096_v0, %v491_v34  ;;  %v2184_v15 = vshrl.u32 %v593_v48, 5  ;;  %v2190_v19 = vmul.f32 %v2133_v8, %v1369_v59 }
  0x94   :  { %v2174_v55 = vsel %vm1042_vm2, %v1041_v37, 0  ;;  %vm512_vm3 = vcmp.lt.s32.totalorder %v490_v54, 4  ;;  %v2193_v20 = vmul.f32 %v2133_v8, %v1373_v4  ;;  %v493_v21 = vshrl.u32 %v2095_v60, %v492_v41 }
  0x95   :  { %v2187_v16 = vand.u32 31, %v2174_v55  ;;  %v508_v22 = vor.u32 %v507_v7, %v506_v14  ;;  %v514_v24 = vsel %vm512_vm3, %v502_v5, 2102212464  ;;  %v596_v25 = vsub.s32 32, %v595_v2 }
  0x96   :  { %v2197_v26 = vadd.s32 1, %v1877_v3  ;;  %vm509_vm4 = vcmp.lt.s32.totalorder %v490_v54, 1  ;;  %vm511_vm5 = vcmp.lt.s32.totalorder %v490_v54, 3  ;;  %v518_v31 = vsel %vm512_vm3, %v505_v13, 920167782 }
  0x97   :  { %v513_v27 = vsel %vm509_vm4, %v493_v21, %v496_v9  ;;  %v515_v29 = vsel %vm511_vm5, %v499_v10, %v514_v24  ;;  %v517_v30 = vsel %vm509_vm4, %v496_v9, %v499_v10  ;;  %v2201_v32 = vsub.s32 32, %v2187_v16 }
  0x98   :  { %vm510_vm6 = vcmp.lt.s32.totalorder %v490_v54, 2  ;;  %v519_v8 = vsel %vm511_vm5, %v502_v5, %v518_v31  ;;  %v521_v34 = vsel %vm509_vm4, %v499_v10, %v502_v5  ;;  %v1380_v35 = vand.u32 2139095040, %v2190_v19 }
  0x99   :  { %v1484_v36 = vand.u32 2139095040, %v2193_v20  ;;  %v520_v37 = vsel %vm510_vm6, %v517_v30, %v519_v8  ;;  %v522_v38 = vsel %vm512_vm3, %v508_v22, 1326507024  ;;  %v516_v39 = vsel %vm510_vm6, %v513_v27, %v515_v29 }
  0x9a   :  { %v523_v40 = vsel %vm511_vm5, %v505_v13, %v522_v38  ;;  %v2207_v41 = vmul.u32.u64.low %v2172_v53, %v520_v37  ;;  %v2208_v42 = vmul.u32.u64.high %v2172_v53, %v520_v37, %v2207_v41  ;;  %vm938_vm7 = vcmp.gt.s32.totalorder %v2197_v26, 0 }
  0x9b   :  { %v524_v46 = vsel %vm510_vm6, %v521_v34, %v523_v40  ;;  %v588_v48 = vand.u32 8388607, %v581_v47  ;;  %v598_v50 = vshll.u32 %v2095_v60, %v595_v2  ;;  %v599_v52 = vshrl.u32 %v2092_v49, %v596_v25 }
  0x9c   :  { %v2217_v54 = vmul.u32.u64.low %v2172_v53, %v524_v46  ;;  %v2218_v56 = vmul.u32.u64.high %v2172_v53, %v524_v46, %v2217_v54  ;;  %v601_v58 = vshll.u32 %v2092_v49, %v595_v2  ;;  %v602_v59 = vshrl.u32 %v2093_v51, %v596_v25 }
  0x9d   :  { %v532_v61 = vmul.u32 %v2172_v53, %v516_v39  ;;  %v600_v62 = vor.u32 %v599_v52, %v598_v50  ;;  %v604_v63 = vshll.u32 %v2093_v51, %v595_v2  ;;  %v605_v1 = vshrl.u32 %v2094_v57, %v596_v25 }
  0x9e   :  { %v535_v3 = vadd.s32 1, %v2208_v42  ;;  %v603_v4 = vor.u32 %v602_v59, %v601_v58  ;;  %v607_v5 = vshll.u32 %v2094_v57, %v595_v2  ;;  %v608_v7 = vshrl.u32 %v2096_v0, %v596_v25 }
  0x9f   :  { %v597_v9 = vshrl.u32 %v2095_v60, %v596_v25  ;;  %v606_v10 = vor.u32 %v605_v1, %v604_v63  ;;  %v610_v13 = vshll.u32 %v2096_v0, %v595_v2  ;;  %v611_v14 = vshrl.u32 %v2097_v6, %v596_v25 }
  0xa0   :  { %vm534_vm8 = vc.u32 %v2218_v56, %v2207_v41  ;;  %v589_v53 = vor.u32 8388608, %v588_v48  ;;  %v609_v21 = vor.u32 %v608_v7, %v607_v5  ;;  %vm613_vm9 = vcmp.lt.s32.totalorder %v2184_v15, 1 }
  0xa1   :  { %v536_v22 = vsel %vm534_vm8, %v535_v3, %v2208_v42  ;;  %v612_v24 = vor.u32 %v611_v14, %v610_v13  ;;  %vm615_vm10 = vcmp.lt.s32.totalorder %v2184_v15, 3  ;;  %vm616_vm11 = vcmp.lt.s32.totalorder %v2184_v15, 4 }
  0xa2   :  { %v537_v27 = vadd.s32 %v536_v22, %v532_v61  ;;  %v618_v29 = vsel %vm616_vm11, %v606_v10, 2102212464  ;;  %v621_v2 = vsel %vm613_vm9, %v600_v62, %v603_v4  ;;  %v622_v25 = vsel %vm616_vm11, %v609_v21, 920167782 }
  0xa3   :  { %vm614_vm12 = vcmp.lt.s32.totalorder %v2184_v15, 2  ;;  %v623_v30 = vsel %vm615_vm10, %v606_v10, %v622_v25  ;;  %v625_v31 = vsel %vm613_vm9, %v603_v4, %v606_v10  ;;  %v626_v8 = vsel %vm616_vm11, %v612_v24, 1326507024 }
  0xa4   :  { %v1381_v34 = vshrl.u32 %v1380_v35, 23  ;;  %v538_v37 = vadd.s32 536870912, %v537_v27  ;;  %v624_v38 = vsel %vm614_vm12, %v621_v2, %v623_v30  ;;  %v627_v39 = vsel %vm615_vm10, %v609_v21, %v626_v8 }
  0xa5   :  { %v617_v40 = vsel %vm613_vm9, %v597_v9, %v600_v62  ;;  %v619_v42 = vsel %vm615_vm10, %v603_v4, %v618_v29  ;;  %v628_v46 = vsel %vm614_vm12, %v625_v31, %v627_v39  ;;  %v629_v48 = vshll.u32 %v589_v53, 8 }
  0xa6   :  { %v2256_v35 = vadd.s32 1, %v2165_v44  ;;  %v2261_v50 = vsel %vm938_vm7, %v2197_v26, 0  ;;  %v1485_v52 = vshrl.u32 %v1484_v36, 23  ;;  %v539_v54 = vshrl.u32 %v538_v37, 30 }
  0xa7   :  { %v2263_v58 = vmul.u32.u64.low %v629_v48, %v628_v46  ;;  %v2264_v59 = vmul.u32.u64.high %v629_v48, %v628_v46, %v2263_v58  ;;  %v2266_v61 = vmul.u32.u64.low %v629_v48, %v624_v38  ;;  %v2267_v62 = vmul.u32.u64.high %v629_v48, %v624_v38, %v2266_v61 }
  0xa8   :  { %v540_v44 = vshll.u32 %v539_v54, 30  ;;  %v620_v26 = vsel %vm614_vm12, %v617_v40, %v619_v42  ;;  %v1031_v36 = vand.u32 2147483647, %v2150_v23  ;;  %v1049_v1 = vshrl.u32 %v2092_v49, %v2201_v32 }
  0xa9   :  { %v2282_v3 = vadd.s32 4294967169, %v2167_v45  ;;  %v2285_v4 = vshrl.u32 %v2174_v55, 5  ;;  %v2288_v28 = vand.u32 31, %v2261_v50  ;;  %v1893_v5 = vadd.s32 4294967169, %v1381_v34 }
  0xaa   :  { %v2290_v7 = vadd.s32 4294967169, %v1485_v52  ;;  %v2292_v9 = vsub.s32 %v537_v27, %v540_v44  ;;  %v563_v15 = vsub.s32 4, %v539_v54  ;;  %v1048_v10 = vshll.u32 %v2095_v60, %v2187_v16 }
  0xab   :  { %v636_v13 = vmul.u32 %v629_v48, %v620_v26  ;;  %vm638_vm15 = vc.u32 %v2264_v59, %v2266_v61  ;;  %v639_v45 = vadd.s32 1, %v2267_v62  ;;  %v1052_v55 = vshrl.u32 %v2093_v51, %v2201_v32 }
  0xac   :  { %v543_v14 = vsub.s32 0, %v2292_v9  ;;  %v1038_v53 = vand.u32 8388607, %v1031_v36  ;;  %v1050_v21 = vor.u32 %v1049_v1, %v1048_v10  ;;  %v1055_v22 = vshrl.u32 %v2094_v57, %v2201_v32 }
  0xad   :  { %v640_v24 = vsel %vm638_vm15, %v639_v45, %v2267_v62  ;;  %v1051_v27 = vshll.u32 %v2092_v49, %v2187_v16  ;;  %v1057_v29 = vshll.u32 %v2094_v57, %v2187_v16  ;;  %v1058_v2 = vshrl.u32 %v2096_v0, %v2201_v32 }
  0xae   :  { %v1862_v25 = vmin.u32 %v543_v14, %v2292_v9  ;;  %v564_v30 = vsel %vm479_vm13, %v563_v15, %v539_v54  ;;  %v641_v31 = vadd.s32 %v640_v24, %v636_v13  ;;  %v1054_v8 = vshll.u32 %v2093_v51, %v2187_v16 }
  0xaf   :  { %v1053_v34 = vor.u32 %v1052_v55, %v1051_v27  ;;  %v1059_v37 = vor.u32 %v1058_v2, %v1057_v29  ;;  %v1060_v38 = vshll.u32 %v2096_v0, %v2187_v16  ;;  %v1061_v39 = vshrl.u32 %v2097_v6, %v2201_v32 }
  0xb0   :  { %vm46_vm0 = vcmp.gt.s32.totalorder %v2256_v35, 0  ;;  %v1387_v40 = vadd.s32 1, %v1893_v5  ;;  %v533_v42 = vadd.s32 %v2207_v41, %v2218_v56  ;;  %v545_v46 = vclz %v1862_v25 }
  0xb1   :  { %v1056_v48 = vor.u32 %v1055_v22, %v1054_v8  ;;  %v566_v52 = vsel %vm2272_vm14, 0, %v564_v30  ;;  %v642_v54 = vadd.s32 536870912, %v641_v31  ;;  %v1047_v58 = vshrl.u32 %v2095_v60, %v2201_v32 }
  0xb2   :  { %v1062_v62 = vor.u32 %v1061_v39, %v1060_v38  ;;  %v1863_v16 = vadd.s32 4294967294, %v545_v46  ;;  %v1039_v44 = vor.u32 8388608, %v1038_v53  ;;  %vm1063_vm1 = vcmp.lt.s32.totalorder %v2285_v4, 1 }
  0xb3   :  { %vm1066_vm2 = vcmp.lt.s32.totalorder %v2285_v4, 4  ;;  %v643_v26 = vshrl.u32 %v642_v54, 30  ;;  %vm1065_vm3 = vcmp.lt.s32.totalorder %v2285_v4, 3  ;;  %v1071_v41 = vsel %vm1063_vm1, %v1050_v21, %v1053_v34 }
  0xb4   :  { %v1072_v56 = vsel %vm1066_vm2, %v1059_v37, 920167782  ;;  %vm1864_vm4 = vcmp.lt.s32.totalorder %v1863_v16, 0  ;;  %vm583_vm5 = vcmp.lt.s32.totalorder %v2143_v17, 0  ;;  %v1075_v1 = vsel %vm1063_vm1, %v1053_v34, %v1056_v48 }
  0xb5   :  { %v1073_v32 = vsel %vm1065_vm3, %v1056_v48, %v1072_v56  ;;  %v1076_v5 = vsel %vm1066_vm2, %v1062_v62, 1326507024  ;;  %v548_v15 = vsel %vm1864_vm4, 0, %v1863_v16  ;;  %v644_v10 = vshll.u32 %v643_v26, 30 }
  0xb6   :  { %vm1064_vm6 = vcmp.lt.s32.totalorder %v2285_v4, 2  ;;  %v1068_v13 = vsel %vm1066_vm2, %v1056_v48, 2102212464  ;;  %v549_v45 = vsub.s32 32, %v548_v15  ;;  %v553_v55 = vsub.s32 4294967266, %v548_v15 }
  0xb7   :  { %v1067_v14 = vsel %vm1063_vm1, %v1047_v58, %v1050_v21  ;;  %v1077_v53 = vsel %vm1065_vm3, %v1059_v37, %v1076_v5  ;;  %v2344_v22 = vsub.s32 %v641_v31, %v644_v10  ;;  %v1074_v24 = vsel %vm1064_vm6, %v1071_v41, %v1073_v32 }
  0xb8   :  { %v1078_v27 = vsel %vm1064_vm6, %v1075_v1, %v1077_v53  ;;  %v1079_v29 = vshll.u32 %v1039_v44, 8  ;;  %v550_v2 = vshll.u32 %v2292_v9, %v548_v15  ;;  %v551_v25 = vshrl.u32 %v533_v42, %v549_v45 }
  0xb9   :  { %v554_v30 = vadd.s32 127, %v553_v55  ;;  %vm2353_vm7 = vcmp.le.f32.partialorder %v581_v47, 0.7853982  ;;  %v1069_v31 = vsel %vm1065_vm3, %v1053_v34, %v1068_v13  ;;  %v647_v8 = vsub.s32 0, %v2344_v22 }
  0xba   :  { %v667_v37 = vsub.s32 4, %v643_v26  ;;  %v2360_v38 = vmul.u32.u64.low %v1079_v29, %v1078_v27  ;;  %v2361_v39 = vmul.u32.u64.high %v1079_v29, %v1078_v27, %v2360_v38  ;;  %v552_v46 = vor.u32 %v551_v25, %v550_v2 }
  0xbb   :  { %v555_v48 = vshll.u32 %v554_v30, 23  ;;  %v2363_v9 = vmul.u32.u64.low %v1079_v29, %v1074_v24  ;;  %v2364_v42 = vmul.u32.u64.high %v1079_v29, %v1074_v24, %v2363_v9  ;;  %v2370_v47 = vsel %vm46_vm0, %v2256_v35, 0 }
  0xbc   :  { %v2373_v54 = vshrl.u32 %v2261_v50, 5  ;;  %v1491_v34 = vadd.s32 1, %v2290_v7  ;;  %v1866_v58 = vmin.u32 %v647_v8, %v2344_v22  ;;  %vm1388_vm8 = vcmp.gt.s32.totalorder %v1387_v40, 0 }
  0xbd   :  { %v556_v62 = vor.u32 4788187, %v555_v48  ;;  %v570_v16 = vadd.s32 3, %v566_v52  ;;  %v1070_v44 = vsel %vm1064_vm6, %v1067_v14, %v1069_v31  ;;  %v2380_v41 = vsub.s32 32, %v2288_v28 }
  0xbe   :  { %v649_v56 = vclz %v1866_v58  ;;  %v668_v35 = vsel %vm583_vm5, %v667_v37, %v643_v26  ;;  %v927_v50 = vand.u32 2147483647, %v2156_v33  ;;  %v559_v1 = vcvt.s32.f32 %v552_v46 }
  0xbf   :  { %v557_v32 = vand.u32 2147483647, %v556_v62  ;;  %vm1088_vm9 = vc.u32 %v2361_v39, %v2363_v9  ;;  %v1089_v7 = vadd.s32 1, %v2364_v42  ;;  %v2388_v52 = vsel %vm1388_vm8, %v1387_v40, 0 }
  0xc0   :  { %vm1492_vm10 = vcmp.gt.s32.totalorder %v1491_v34, 0  ;;  %v1867_v4 = vadd.s32 4294967294, %v649_v56  ;;  %v1086_v5 = vmul.u32 %v1079_v29, %v1070_v44  ;;  %v2390_v10 = vand.u32 3, %v570_v16 }
  0xc1   :  { %v560_v15 = vmul.f32 %v559_v1, %v557_v32  ;;  %v637_v26 = vadd.s32 %v2266_v61, %v2264_v59  ;;  %v1090_v13 = vsel %vm1088_vm9, %v1089_v7, %v2364_v42  ;;  %v670_v45 = vsel %vm2353_vm7, 0, %v668_v35 }
  0xc2   :  { %vm1868_vm11 = vcmp.lt.s32.totalorder %v1867_v4, 0  ;;  %v1091_v55 = vadd.s32 %v1090_v13, %v1086_v5  ;;  %v2399_v40 = vand.u32 8388607, %v927_v50  ;;  %v944_v24 = vshll.u32 %v2095_v60, %v2288_v28 }
  0xc3   :  { %v561_v14 = vxor.u32 2147483648, %v560_v15  ;;  %v652_v53 = vsel %vm1868_vm11, 0, %v1867_v4  ;;  %v945_v27 = vshrl.u32 %v2092_v49, %v2380_v41  ;;  %v947_v2 = vshll.u32 %v2092_v49, %v2288_v28 }
  0xc4   :  { %v653_v59 = vsub.s32 32, %v652_v53  ;;  %v657_v61 = vsub.s32 4294967266, %v652_v53  ;;  %v1092_v29 = vadd.s32 536870912, %v1091_v55  ;;  %v654_v30 = vshll.u32 %v2344_v22, %v652_v53 }
  0xc5   :  { %v562_v25 = vsel %vm479_vm13, %v561_v14, %v560_v15  ;;  %v948_v31 = vshrl.u32 %v2093_v51, %v2380_v41  ;;  %v951_v8 = vshrl.u32 %v2094_v57, %v2380_v41  ;;  %v950_v42 = vshll.u32 %v2093_v51, %v2288_v28 }
  0xc6   :  { %v565_v37 = vsel %vm2272_vm14, %v2136_v11, %v562_v25  ;;  %v655_v38 = vshrl.u32 %v637_v26, %v653_v59  ;;  %v658_v46 = vadd.s32 127, %v657_v61  ;;  %v2417_v48 = vshrl.u32 %v1092_v29, 30 }
  0xc7   :  { %2000 = vcosq.f32 %v565_v37  ;;  %v953_v22 = vshll.u32 %v2094_v57, %v2288_v28  ;;  %v954_v58 = vshrl.u32 %v2096_v0, %v2380_v41  ;;  %v946_v44 = vor.u32 %v945_v27, %v944_v24 }
  0xc8   :  { %2002 = vsinq.f32 %v565_v37  ;;  %v656_v62 = vor.u32 %v655_v38, %v654_v30  ;;  %v659_v16 = vshll.u32 %v658_v46, 23  ;;  %v1094_v63 = vshll.u32 %v2417_v48, 30 }
  0xc9   :  { %v949_v56 = vor.u32 %v948_v31, %v947_v2  ;;  %v955_v35 = vor.u32 %v954_v58, %v953_v22  ;;  %v957_v32 = vshrl.u32 %v2097_v6, %v2380_v41  ;;  %v952_v4 = vor.u32 %v951_v8, %v950_v42 }
  0xca   :  { %v660_v1 = vor.u32 4788187, %v659_v16  ;;  %v2428_v7 = vsub.s32 %v1091_v55, %v1094_v63  ;;  %v956_v5 = vshll.u32 %v2096_v0, %v2288_v28  ;;  %v2433_v15 = vand.u32 31, %v2388_v52 }
  0xcb   :  { %v2436_v26 = vsel %vm1492_vm10, %v1491_v34, 0  ;;  %v663_v13 = vcvt.s32.f32 %v656_v62  ;;  %v674_v14 = vadd.s32 3, %v670_v45  ;;  %vm962_vm12 = vcmp.lt.s32.totalorder %v2373_v54, 4 }
  0xcc   :  { %v661_v53 = vand.u32 2147483647, %v660_v1  ;;  %v1097_v24 = vsub.s32 0, %v2428_v7  ;;  %v958_v27 = vor.u32 %v957_v32, %v956_v5  ;;  %v935_v55 = vor.u32 8388608, %v2399_v40 }
  0xcd   :  { %vm959_vm13 = vcmp.lt.s32.totalorder %v2373_v54, 1  ;;  %vm961_vm14 = vcmp.lt.s32.totalorder %v2373_v54, 3  ;;  %v968_v28 = vsel %vm962_vm12, %v955_v35, 920167782  ;;  %vm576_vm15 = vcmp.eq.s32.totalorder %v2390_v10, 2 }
  0xce   :  { %v664_v34 = vmul.f32 %v663_v13, %v661_v53  ;;  %v1882_v45 = vmin.u32 %v1097_v24, %v2428_v7  ;;  %v967_v59 = vsel %vm959_vm13, %v946_v44, %v949_v56  ;;  %v969_v61 = vsel %vm961_vm14, %v952_v4, %v968_v28 }
  0xcf   :  { %vm573_vm0 = vcmp.eq.s32.totalorder %v2390_v10, 0  ;;  %v2452_v40 = vand.u32 3, %v674_v14  ;;  %v943_v29 = vshrl.u32 %v2095_v60, %v2380_v41  ;;  %vm960_vm1 = vcmp.lt.s32.totalorder %v2373_v54, 2 }
  0xd0   :  { %v971_v2 = vsel %vm959_vm13, %v949_v56, %v952_v4  ;;  %vm572_vm2 = vcmp.lt.s32.totalorder %v2390_v10, 2  ;;  %v665_v25 = vxor.u32 2147483648, %v664_v34  ;;  %vm1033_vm3 = vcmp.lt.s32.totalorder %v2150_v23, 0 }
  0xd1   :  { %v1099_v30 = vclz %v1882_v45  ;;  %v964_v31 = vsel %vm962_vm12, %v952_v4, 2102212464  ;;  %v972_v8 = vsel %vm962_vm12, %v958_v27, 1326507024  ;;  %vm569_vm4 = vweird.f32 %v2136_v11 }
  0xd2   :  { %v1087_v41 = vadd.s32 %v2363_v9, %v2361_v39  ;;  %v970_v37 = vsel %vm960_vm1, %v967_v59, %v969_v61  ;;  %v973_v38 = vsel %vm961_vm14, %v955_v35, %v972_v8  ;;  %v975_v46 = vshll.u32 %v935_v55, 8 }
  0xd3   :  { %v666_v42 = vsel %vm583_vm5, %v665_v25, %v664_v34  ;;  %v1883_v22 = vadd.s32 4294967294, %v1099_v30  ;;  %v963_v58 = vsel %vm959_vm13, %v943_v29, %v946_v44  ;;  %v974_v62 = vsel %vm960_vm1, %v971_v2, %v973_v38 }
  0xd4   :  { %v669_v39 = vsel %vm2353_vm7, %v2143_v17, %v666_v42  ;;  %v965_v9 = vsel %vm961_vm14, %v949_v56, %v964_v31  ;;  %v2483_v16 = vmul.u32.u64.low %v975_v46, %v974_v62  ;;  %v2484_v63 = vmul.u32.u64.high %v975_v46, %v974_v62, %v2483_v16  ;;  %v2001_v35 = vpop.eup %2000 }
  0xd5   :  { %2004 = vcosq.f32 %v669_v39  ;;  %vm1884_vm5 = vcmp.lt.s32.totalorder %v1883_v22, 0  ;;  %v2486_v32 = vmul.u32.u64.low %v975_v46, %v970_v37  ;;  %v2487_v1 = vmul.u32.u64.high %v975_v46, %v970_v37, %v2486_v32  ;;  %v2003_v44 = vpop.eup %2002 }
  0xd6   :  { %v577_v4 = vxor.u32 2147483648, %v2001_v35  ;;  %2006 = vsinq.f32 %v669_v39  ;;  %v1102_v5 = vsel %vm1884_vm5, 0, %v1883_v22  ;;  %v1117_v21 = vsub.s32 4, %v2417_v48 }
  0xd7   :  { %v574_v13 = vxor.u32 2147483648, %v2003_v44  ;;  %v1103_v14 = vsub.s32 32, %v1102_v5  ;;  %v1107_v53 = vsub.s32 4294967266, %v1102_v5  ;;  %v966_v56 = vsel %vm960_vm1, %v963_v58, %v965_v9 }
  0xd8   :  { %v578_v24 = vsel %vm576_vm15, %v577_v4, %v2003_v44  ;;  %v1104_v27 = vshll.u32 %v2428_v7, %v1102_v5  ;;  %vm984_vm6 = vc.u32 %v2484_v63, %v2486_v32  ;;  %v1377_v55 = vand.u32 2147483647, %v2190_v19 }
  0xd9   :  { %v575_v28 = vsel %vm573_vm0, %v2001_v35, %v574_v13  ;;  %v1105_v34 = vshrl.u32 %v1087_v41, %v1103_v14  ;;  %v1108_v45 = vadd.s32 127, %v1107_v53  ;;  %v985_v59 = vadd.s32 1, %v2487_v1 }
  0xda   :  { %v1392_v54 = vsub.s32 32, %v2433_v15  ;;  %v579_v61 = vsel %vm572_vm2, %v575_v28, %v578_v24  ;;  %v1118_v7 = vsel %vm1033_vm3, %v1117_v21, %v2417_v48  ;;  %v982_v29 = vmul.u32 %v975_v46, %v966_v56 }
  0xdb   :  { %v580_v2 = vsel %vm569_vm4, nan, %v579_v61  ;;  %v1106_v25 = vor.u32 %v1105_v34, %v1104_v27  ;;  %v1109_v30 = vshll.u32 %v1108_v45, 23  ;;  %v986_v31 = vsel %vm984_vm6, %v985_v59, %v2487_v1 }
  0xdc   :  { %v2512_v8 = vshrl.u32 %v2388_v52, 5  ;;  %v2515_v41 = vand.u32 31, %v2436_v26  ;;  %687 = vrot.lane.b32.xlu0 %v580_v2, %s2098_s0  ;;  %vm2520_vm7 = vcmp.le.f32.partialorder %v1031_v36, 0.7853982  ;;  %v987_v11 = vadd.s32 %v986_v31, %v982_v29 }
  0xdd   :  { %vm677_vm8 = vcmp.eq.s32.totalorder %v2452_v40, 0  ;;  %v1110_v48 = vor.u32 4788187, %v1109_v30  ;;  %v1120_v52 = vsel %vm2520_vm7, 0, %v1118_v7  ;;  %v1384_v37 = vand.u32 8388607, %v1377_v55 }
  0xde   :  { %vm676_vm9 = vcmp.lt.s32.totalorder %v2452_v40, 2  ;;  %v1113_v38 = vcvt.s32.f32 %v1106_v25  ;;  %v988_v46 = vadd.s32 536870912, %v987_v11  ;;  %v1394_v36 = vshll.u32 %v2095_v60, %v2433_v15 }
  0xdf   :  { %v1395_v42 = vshrl.u32 %v2092_v49, %v1392_v54  ;;  %vm673_vm10 = vweird.f32 %v2143_v17  ;;  %v1111_v22 = vand.u32 2147483647, %v1110_v48  ;;  %v1397_v58 = vshll.u32 %v2092_v49, %v2433_v15 }
  0xe0   :  { %v1398_v62 = vshrl.u32 %v2093_v51, %v1392_v54  ;;  %v1400_v39 = vshll.u32 %v2093_v51, %v2433_v15  ;;  %v2539_v9 = vshrl.u32 %v988_v46, 30  ;;  %v1401_v16 = vshrl.u32 %v2094_v57, %v1392_v54 }
  0xe1   :  { %v1403_v35 = vshll.u32 %v2094_v57, %v2433_v15  ;;  %v1404_v1 = vshrl.u32 %v2096_v0, %v1392_v54  ;;  %vm680_vm11 = vcmp.eq.s32.totalorder %v2452_v40, 2  ;;  %v1114_v44 = vmul.f32 %v1113_v38, %v1111_v22 }
  0xe2   :  { %v1406_v4 = vshll.u32 %v2096_v0, %v2433_v15  ;;  %v1407_v5 = vshrl.u32 %v2097_v6, %v1392_v54  ;;  %v2005_v21 = vpop.eup %2004  ;;  %v1124_v13 = vadd.s32 3, %v1120_v52  ;;  %v990_v14 = vshll.u32 %v2539_v9, 30 }
  0xe3   :  { %v1385_v53 = vor.u32 8388608, %v1384_v37  ;;  %v1393_v56 = vshrl.u32 %v2095_v60, %v1392_v54  ;;  %v2007_v24 = vpop.eup %2006  ;;  %v681_v27 = vxor.u32 2147483648, %v2005_v21  ;;  %v1115_v28 = vxor.u32 2147483648, %v1114_v44 }
  0xe4   :  { %v1396_v34 = vor.u32 %v1395_v42, %v1394_v36  ;;  %v1399_v45 = vor.u32 %v1398_v62, %v1397_v58  ;;  %v678_v59 = vxor.u32 2147483648, %v2007_v24  ;;  %v2551_v61 = vsub.s32 %v987_v11, %v990_v14 }
  0xe5   :  { %v1402_v7 = vor.u32 %v1401_v16, %v1400_v39  ;;  %v1405_v29 = vor.u32 %v1404_v1, %v1403_v35  ;;  %v682_v15 = vsel %vm680_vm11, %v681_v27, %v2007_v24  ;;  %v1116_v2 = vsel %vm1033_vm3, %v1115_v28, %v1114_v44 }
  0xe6   :  { %v1408_v25 = vor.u32 %v1407_v5, %v1406_v4  ;;  %vm1412_vm12 = vcmp.lt.s32.totalorder %v2512_v8, 4  ;;  %v679_v54 = vsel %vm677_vm8, %v2005_v21, %v678_v59  ;;  %v1119_v30 = vsel %vm2520_vm7, %v2150_v23, %v1116_v2 }
  0xe7   :  { %v993_v31 = vsub.s32 0, %v2551_v61  ;;  %vm1409_vm13 = vcmp.lt.s32.totalorder %v2512_v8, 1  ;;  %v683_v11 = vsel %vm676_vm9, %v679_v54, %v682_v15  ;;  %2008 = vcosq.f32 %v1119_v30 }
  0xe8   :  { %vm1410_vm14 = vcmp.lt.s32.totalorder %v2512_v8, 2  ;;  %vm1411_vm15 = vcmp.lt.s32.totalorder %v2512_v8, 3  ;;  %v684_v48 = vsel %vm673_vm10, nan, %v683_v11  ;;  %2010 = vsinq.f32 %v1119_v30 }
  0xe9   :  { %v1878_v52 = vmin.u32 %v993_v31, %v2551_v61  ;;  %v1414_v10 = vsel %vm1412_vm12, %v1402_v7, 2102212464  ;;  %689 = vrot.lane.b32.xlu1 %v684_v48, %s2098_s0  ;;  %v1417_v40 = vsel %vm1409_vm13, %v1396_v34, %v1399_v45  ;;  %v1418_v37 = vsel %vm1412_vm12, %v1405_v29, 920167782 }
  0xea   :  { %v1421_v38 = vsel %vm1409_vm13, %v1399_v45, %v1402_v7  ;;  %v1422_v46 = vsel %vm1412_vm12, %v1408_v25, 1326507024  ;;  %v2584_v36 = vsub.s32 32, %v2515_v41  ;;  %v2586_v42 = vand.u32 3, %v1124_v13 }
  0xeb   :  { %v995_v22 = vclz %v1878_v52  ;;  %v1013_v58 = vsub.s32 4, %v2539_v9  ;;  %v1413_v62 = vsel %vm1409_vm13, %v1393_v56, %v1396_v34  ;;  %v1419_v39 = vsel %vm1411_vm15, %v1402_v7, %v1418_v37 }
  0xec   :  { %v1423_v16 = vsel %vm1411_vm15, %v1405_v29, %v1422_v46  ;;  %v1425_v35 = vshll.u32 %v1385_v53, 8  ;;  %v1415_v44 = vsel %vm1411_vm15, %v1399_v45, %v1414_v10  ;;  %v1420_v4 = vsel %vm1410_vm14, %v1417_v40, %v1419_v39 }
  0xed   :  { %v1879_v1 = vadd.s32 4294967294, %v995_v22  ;;  %v1424_v5 = vsel %vm1410_vm14, %v1421_v38, %v1423_v16  ;;  %v2609_v24 = vand.u32 31, %v2370_v47  ;;  %v2612_v53 = vshrl.u32 %v2436_v26, 5 }
  0xee   :  { %v2601_v21 = vmul.u32.u64.low %v1425_v35, %v1424_v5  ;;  %v2602_v13 = vmul.u32.u64.high %v1425_v35, %v1424_v5, %v2601_v21  ;;  %v2604_v14 = vmul.u32.u64.low %v1425_v35, %v1420_v4  ;;  %v2605_v56 = vmul.u32.u64.high %v1425_v35, %v1420_v4, %v2604_v14 }
  0xef   :  { %vm929_vm0 = vcmp.lt.s32.totalorder %v2156_v33, 0  ;;  %vm1880_vm1 = vcmp.lt.s32.totalorder %v1879_v1, 0  ;;  %vm1127_vm2 = vcmp.eq.s32.totalorder %v2586_v42, 0  ;;  %v1416_v28 = vsel %vm1410_vm14, %v1413_v62, %v1415_v44 }
  0xf0   :  { %v998_v27 = vsel %vm1880_vm1, 0, %v1879_v1  ;;  %v1481_v34 = vand.u32 2147483647, %v2193_v20  ;;  %v1499_v45 = vshrl.u32 %v2092_v49, %v2584_v36  ;;  %vm1126_vm3 = vcmp.lt.s32.totalorder %v2586_v42, 2 }
  0xf1   :  { %vm1130_vm4 = vcmp.eq.s32.totalorder %v2586_v42, 2  ;;  %v983_v26 = vadd.s32 %v2486_v32, %v2484_v63  ;;  %v999_v59 = vsub.s32 32, %v998_v27  ;;  %v1003_v7 = vsub.s32 4294967266, %v998_v27 }
  0xf2   :  { %vm1123_vm5 = vweird.f32 %v2150_v23  ;;  %v2629_v8 = vsel %vm929_vm0, %v1013_v58, %v2539_v9  ;;  %vm1434_vm6 = vc.u32 %v2602_v13, %v2604_v14  ;;  %v1435_v29 = vadd.s32 1, %v2605_v56 }
  0xf3   :  { %v1498_v15 = vshll.u32 %v2095_v60, %v2515_v41  ;;  %v1000_v2 = vshll.u32 %v2551_v61, %v998_v27  ;;  %v1001_v63 = vshrl.u32 %v983_v26, %v999_v59  ;;  %v1004_v32 = vadd.s32 127, %v1003_v7 }
  0xf4   :  { %v1432_v25 = vmul.u32 %v1425_v35, %v1416_v28  ;;  %vm2639_vm7 = vcmp.le.f32.partialorder %v927_v50, 0.7853982  ;;  %v1436_v9 = vsel %vm1434_vm6, %v1435_v29, %v2605_v56  ;;  %v1488_v30 = vand.u32 8388607, %v1481_v34  ;;  %v2009_v48 = vpop.eup %2008 }
  0xf5   :  { %v1500_v31 = vor.u32 %v1499_v45, %v1498_v15  ;;  %v1502_v11 = vshrl.u32 %v2093_v51, %v2584_v36  ;;  %v1002_v61 = vor.u32 %v1001_v63, %v1000_v2  ;;  %v1005_v52 = vshll.u32 %v1004_v32, 23  ;;  %v2011_v50 = vpop.eup %2010 }
  0xf6   :  { %v1437_v10 = vadd.s32 %v1436_v9, %v1432_v25  ;;  %v1501_v40 = vshll.u32 %v2092_v49, %v2515_v41  ;;  %v1131_v37 = vxor.u32 2147483648, %v2009_v48  ;;  %v1505_v38 = vshrl.u32 %v2094_v57, %v2584_v36 }
  0xf7   :  { %v1507_v46 = vshll.u32 %v2094_v57, %v2515_v41  ;;  %v1508_v22 = vshrl.u32 %v2096_v0, %v2584_v36  ;;  %v1128_v58 = vxor.u32 2147483648, %v2011_v50  ;;  %v1006_v62 = vor.u32 4788187, %v1005_v52 }
  0xf8   :  { %v1438_v39 = vadd.s32 536870912, %v1437_v10  ;;  %v1504_v16 = vshll.u32 %v2093_v51, %v2515_v41  ;;  %v1132_v35 = vsel %vm1130_vm4, %v1131_v37, %v2011_v50  ;;  %v1503_v1 = vor.u32 %v1502_v11, %v1501_v40 }
  0xf9   :  { %v1509_v44 = vor.u32 %v1508_v22, %v1507_v46  ;;  %v1511_v4 = vshrl.u32 %v2097_v6, %v2584_v36  ;;  %v1129_v5 = vsel %vm1127_vm2, %v2009_v48, %v1128_v58  ;;  %v1007_v21 = vand.u32 2147483647, %v1006_v62 }
  0xfa   :  { %v1009_v56 = vcvt.s32.f32 %v1002_v61  ;;  %v1439_v27 = vshrl.u32 %v1438_v39, 30  ;;  %v1133_v28 = vsel %vm1126_vm3, %v1129_v5, %v1132_v35  ;;  %v1506_v45 = vor.u32 %v1505_v38, %v1504_v16 }
  0xfb   :  { %v1510_v26 = vshll.u32 %v2096_v0, %v2515_v41  ;;  %vm1513_vm8 = vcmp.lt.s32.totalorder %v2612_v53, 1  ;;  %v1134_v59 = vsel %vm1123_vm5, nan, %v1133_v28  ;;  %vm1516_vm9 = vcmp.lt.s32.totalorder %v2612_v53, 4 }
  0xfc   :  { %v1010_v7 = vmul.f32 %v1009_v56, %v1007_v21  ;;  %v1440_v29 = vshll.u32 %v1439_v27, 30  ;;  %1139 = vrot.lane.b32.xlu1 %v1134_v59, %s2099_s15  ;;  %v1489_v15 = vor.u32 8388608, %v1488_v30  ;;  %v1521_v42 = vsel %vm1513_vm8, %v1500_v31, %v1503_v1 }
  0xfd   :  { %v1512_v2 = vor.u32 %v1511_v4, %v1510_v26  ;;  %v1522_v41 = vsel %vm1516_vm9, %v1509_v44, 920167782  ;;  %v1016_v32 = vsel %vm2639_vm7, 0, %v2629_v8  ;;  %vm1515_vm10 = vcmp.lt.s32.totalorder %v2612_v53, 3 }
  0xfe   :  { %v1011_v63 = vxor.u32 2147483648, %v1010_v7  ;;  %v1441_v25 = vsub.s32 %v1437_v10, %v1440_v29  ;;  %v1497_v9 = vshrl.u32 %v2095_v60, %v2584_v36  ;;  %vm1514_vm11 = vcmp.lt.s32.totalorder %v2612_v53, 2 }
  0xff   :  { %v1518_v30 = vsel %vm1516_vm9, %v1506_v45, 2102212464  ;;  %v1523_v11 = vsel %vm1515_vm10, %v1506_v45, %v1522_v41  ;;  %v1525_v52 = vsel %vm1513_vm8, %v1503_v1, %v1506_v45  ;;  %v1526_v40 = vsel %vm1516_vm9, %v1512_v2, 1326507024 }
 0x100   :  { %v1012_v48 = vsel %vm929_vm0, %v1011_v63, %v1010_v7  ;;  %v1443_v61 = vsub.s32 0, %v1441_v25  ;;  %v1524_v8 = vsel %vm1514_vm11, %v1521_v42, %v1523_v11  ;;  %v1517_v10 = vsel %vm1513_vm8, %v1497_v9, %v1500_v31 }
 0x101   :  { %v1015_v36 = vsel %vm2639_vm7, %v2156_v33, %v1012_v48  ;;  %v1529_v50 = vshll.u32 %v1489_v15, 8  ;;  %v1519_v38 = vsel %vm1515_vm10, %v1503_v1, %v1518_v30  ;;  %v1527_v46 = vsel %vm1515_vm10, %v1509_v44, %v1526_v40 }
 0x102   :  { %2012 = vcosq.f32 %v1015_v36  ;;  %v1894_v37 = vmin.u32 %v1443_v61, %v1441_v25  ;;  %v1528_v54 = vsel %vm1514_vm11, %v1525_v52, %v1527_v46  ;;  %v1020_v31 = vadd.s32 3, %v1016_v32 }
 0x103   :  { %2014 = vsinq.f32 %v1015_v36  ;;  %v2707_v22 = vmul.u32.u64.low %v1529_v50, %v1524_v8  ;;  %v2708_v58 = vmul.u32.u64.high %v1529_v50, %v1524_v8, %v2707_v22  ;;  %v1463_v39 = vsub.s32 4, %v1439_v27 }
 0x104   :  { %v1445_v62 = vclz %v1894_v37  ;;  %v2711_v16 = vmul.u32.u64.low %v1529_v50, %v1528_v54  ;;  %v2712_v35 = vmul.u32.u64.high %v1529_v50, %v1528_v54, %v2711_v16  ;;  %v1520_v1 = vsel %vm1514_vm11, %v1517_v10, %v1519_v38 }
 0x105   :  { %v698_v44 = vand.u32 2147483647, %v2163_v43  ;;  %v701_v5 = vand.u32 2139095040, %v2163_v43  ;;  %v2719_v21 = vsub.s32 32, %v2609_v24  ;;  %v2723_v56 = vshll.u32 %v2094_v57, %v2609_v24 }
 0x106   :  { %v1895_v4 = vadd.s32 4294967294, %v1445_v62  ;;  %v2726_v28 = vadd.s32 1, %v2282_v3  ;;  %v1539_v45 = vadd.s32 1, %v2708_v58  ;;  %v1021_v26 = vand.u32 3, %v1020_v31 }
 0x107   :  { %vm1379_vm12 = vcmp.lt.s32.totalorder %v2190_v19, 0  ;;  %v702_v53 = vshrl.u32 %v701_v5, 23  ;;  %v1536_v29 = vmul.u32 %v1529_v50, %v1520_v1  ;;  %vm1538_vm14 = vc.u32 %v2712_v35, %v2707_v22 }
 0x108   :  { %vm1896_vm13 = vcmp.lt.s32.totalorder %v1895_v4, 0  ;;  %v1464_v7 = vsel %vm1379_vm12, %v1463_v39, %v1439_v27  ;;  %v1433_v15 = vadd.s32 %v2604_v14, %v2602_v13  ;;  %v1540_v42 = vsel %vm1538_vm14, %v1539_v45, %v2708_v58 }
 0x109   :  { %v1448_v59 = vsel %vm1896_vm13, 0, %v1895_v4  ;;  %vm2739_vm15 = vcmp.le.f32.partialorder %v1377_v55, 0.7853982  ;;  %v1541_v63 = vadd.s32 %v1540_v42, %v1536_v29  ;;  %v1869_v32 = vadd.s32 4294967169, %v702_v53 }
 0x10a   :  { %v1449_v3 = vsub.s32 32, %v1448_v59  ;;  %v1453_v2 = vsub.s32 4294967266, %v1448_v59  ;;  %v2744_v27 = vadd.f32 1.5707964, %v2139_v12  ;;  %v1450_v9 = vshll.u32 %v1441_v25, %v1448_v59 }
 0x10b   :  { %v1466_v13 = vsel %vm2739_vm15, 0, %v1464_v7  ;;  %vm1019_vm0 = vweird.f32 %v2156_v33  ;;  %v1542_v14 = vadd.s32 536870912, %v1541_v63  ;;  %v705_v55 = vand.u32 8388607, %v698_v44 }
 0x10c   :  { %v1451_v30 = vshrl.u32 %v1433_v15, %v1449_v3  ;;  %v1454_v11 = vadd.s32 127, %v1453_v2  ;;  %v708_v48 = vadd.s32 1, %v1869_v32  ;;  %vm1022_vm1 = vcmp.lt.s32.totalorder %v1021_v26, 2 }
 0x10d   :  { %vm1023_vm2 = vcmp.eq.s32.totalorder %v1021_v26, 0  ;;  %v1470_v36 = vadd.s32 3, %v1466_v13  ;;  %v2751_v10 = vshrl.u32 %v1542_v14, 30  ;;  %v251_v25 = vand.u32 2139095040, %v2744_v27 }
 0x10e   :  { %v1452_v61 = vor.u32 %v1451_v30, %v1450_v9  ;;  %v1455_v8 = vshll.u32 %v1454_v11, 23  ;;  %vm709_vm3 = vcmp.gt.s32.totalorder %v708_v48, 0  ;;  %vm1026_vm4 = vcmp.eq.s32.totalorder %v1021_v26, 2 }
 0x10f   :  { %v2013_v52 = vpop.eup %2012  ;;  %v710_v38 = vsel %vm709_vm3, %v708_v48, 0  ;;  %v1544_v54 = vshll.u32 %v2751_v10, 30  ;;  %v706_v58 = vor.u32 8388608, %v705_v55  ;;  %v248_v31 = vand.u32 2147483647, %v2744_v27 }
 0x110   :  { %v2015_v40 = vpop.eup %2014  ;;  %v1027_v50 = vxor.u32 2147483648, %v2013_v52  ;;  %v1456_v37 = vor.u32 4788187, %v1455_v8  ;;  %v1459_v16 = vcvt.s32.f32 %v1452_v61  ;;  %v712_v4 = vand.u32 31, %v710_v38 }
 0x111   :  { %v1024_v46 = vxor.u32 2147483648, %v2015_v40  ;;  %v2757_v5 = vand.u32 3, %v1470_v36  ;;  %v2759_v45 = vsub.s32 %v1541_v63, %v1544_v54  ;;  %v252_v53 = vshrl.u32 %v251_v25, 23 }
 0x112   :  { %v1028_v62 = vsel %vm1026_vm4, %v1027_v50, %v2015_v40  ;;  %v1457_v39 = vand.u32 2147483647, %v1456_v37  ;;  %v713_v29 = vsub.s32 32, %v712_v4  ;;  %v2763_v15 = vadd.f32 1.5707964, %v2156_v33 }
 0x113   :  { %v1025_v1 = vsel %vm1023_vm2, %v2013_v52, %v1024_v46  ;;  %v1537_v2 = vadd.s32 %v2707_v22, %v2712_v35  ;;  %v1547_v42 = vsub.s32 0, %v2759_v45  ;;  %v711_v32 = vshrl.u32 %v710_v38, 5 }
 0x114   :  { %v1029_v59 = vsel %vm1022_vm1, %v1025_v1, %v1028_v62  ;;  %v1460_v7 = vmul.f32 %v1459_v16, %v1457_v39  ;;  %v716_v26 = vshrl.u32 %v2092_v49, %v713_v29  ;;  %v2772_v9 = vshll.u32 %v706_v58, 8 }
 0x115   :  { %v1030_v3 = vsel %vm1019_vm0, nan, %v1029_v59  ;;  %v2776_v30 = vand.u32 8388607, %v248_v31  ;;  %v1898_v33 = vmin.u32 %v1547_v42, %v2759_v45  ;;  %v1567_v11 = vsub.s32 4, %v2751_v10 }
 0x116   :  { %1137 = vrot.lane.b32.xlu0 %v1030_v3, %s2099_s15  ;;  %v1461_v63 = vxor.u32 2147483648, %v1460_v7  ;;  %v719_v22 = vshrl.u32 %v2093_v51, %v713_v29  ;;  %v1853_v35 = vadd.s32 4294967169, %v252_v53  ;;  %v715_v14 = vshll.u32 %v2095_v60, %v712_v4 }
 0x117   :  { %v721_v55 = vshll.u32 %v2093_v51, %v712_v4  ;;  %v722_v48 = vshrl.u32 %v2094_v57, %v713_v29  ;;  %vm1483_vm5 = vcmp.lt.s32.totalorder %v2193_v20, 0  ;;  %v1549_v8 = vclz %v1898_v33 }
 0x118   :  { %v1462_v13 = vsel %vm1379_vm12, %v1461_v63, %v1460_v7  ;;  %v718_v52 = vshll.u32 %v2092_v49, %v712_v4  ;;  %vm730_vm6 = vcmp.lt.s32.totalorder %v711_v32, 1  ;;  %v717_v36 = vor.u32 %v716_v26, %v715_v14 }
 0x119   :  { %v1465_v61 = vsel %vm2739_vm15, %v2190_v19, %v1462_v13  ;;  %v723_v25 = vor.u32 %v722_v48, %v721_v55  ;;  %v724_v40 = vshll.u32 %v2094_v57, %v712_v4  ;;  %v1899_v50 = vadd.s32 4294967294, %v1549_v8 }
 0x11a   :  { %2016 = vcosq.f32 %v1465_v61  ;;  %v720_v37 = vor.u32 %v719_v22, %v718_v52  ;;  %v725_v38 = vshrl.u32 %v2096_v0, %v713_v29  ;;  %v714_v46 = vshrl.u32 %v2095_v60, %v713_v29 }
 0x11b   :  { %2018 = vsinq.f32 %v1465_v61  ;;  %v727_v41 = vshll.u32 %v2096_v0, %v712_v4  ;;  %v728_v54 = vshrl.u32 %v2097_v6, %v713_v29  ;;  %vm733_vm7 = vcmp.lt.s32.totalorder %v711_v32, 4 }
 0x11c   :  { %vm2798_vm8 = vcmp.le.f32.partialorder %v1481_v34, 0.7853982  ;;  %vm1900_vm9 = vcmp.lt.s32.totalorder %v1899_v50, 0  ;;  %v726_v62 = vor.u32 %v725_v38, %v724_v40  ;;  %vm731_vm10 = vcmp.lt.s32.totalorder %v711_v32, 2 }
 0x11d   :  { %v735_v39 = vsel %vm733_vm7, %v723_v25, 2102212464  ;;  %v1552_v16 = vsel %vm1900_vm9, 0, %v1899_v50  ;;  %v729_v1 = vor.u32 %v728_v54, %v727_v41  ;;  %vm732_vm11 = vcmp.lt.s32.totalorder %v711_v32, 3 }
 0x11e   :  { %v734_v53 = vsel %vm730_vm6, %v714_v46, %v717_v36  ;;  %v1553_v4 = vsub.s32 32, %v1552_v16  ;;  %v1557_v59 = vsub.s32 4294967266, %v1552_v16  ;;  %v736_v7 = vsel %vm732_vm11, %v720_v37, %v735_v39 }
 0x11f   :  { %v738_v29 = vsel %vm730_vm6, %v717_v36, %v720_v37  ;;  %v1554_v34 = vshll.u32 %v2759_v45, %v1552_v16  ;;  %v739_v3 = vsel %vm733_vm7, %v726_v62, 920167782  ;;  %v742_v42 = vsel %vm730_vm6, %v720_v37, %v723_v25 }
 0x120   :  { %v743_v63 = vsel %vm733_vm7, %v729_v1, 1326507024  ;;  %v1555_v26 = vshrl.u32 %v1537_v2, %v1553_v4  ;;  %v1558_v33 = vadd.s32 127, %v1557_v59  ;;  %v740_v22 = vsel %vm732_vm11, %v723_v25, %v739_v3 }
 0x121   :  { %v744_v13 = vsel %vm732_vm11, %v726_v62, %v743_v63  ;;  %v1568_v14 = vsel %vm1483_vm5, %v1567_v11, %v2751_v10  ;;  %v741_v55 = vsel %vm731_vm10, %v738_v29, %v740_v22  ;;  %v258_v61 = vadd.s32 1, %v1853_v35 }
 0x122   :  { %v745_v48 = vsel %vm731_vm10, %v742_v42, %v744_v13  ;;  %v1556_v45 = vor.u32 %v1555_v26, %v1554_v34  ;;  %v1559_v8 = vshll.u32 %v1558_v33, 23  ;;  %vm1469_vm12 = vweird.f32 %v2190_v19 }
 0x123   :  { %v2815_v52 = vmul.u32.u64.low %v2772_v9, %v745_v48  ;;  %v2816_v36 = vmul.u32.u64.high %v2772_v9, %v745_v48, %v2815_v52  ;;  %v737_v2 = vsel %vm731_vm10, %v734_v53, %v736_v7  ;;  %vm259_vm13 = vcmp.gt.s32.totalorder %v258_v61, 0 }
 0x124   :  { %v2821_v25 = vmul.u32.u64.low %v2772_v9, %v741_v55  ;;  %v2822_v40 = vmul.u32.u64.high %v2772_v9, %v741_v55, %v2821_v25  ;;  %vm1472_vm14 = vcmp.lt.s32.totalorder %v2757_v5, 2  ;;  %vm1473_vm15 = vcmp.eq.s32.totalorder %v2757_v5, 0 }
 0x125   :  { %v1560_v10 = vor.u32 4788187, %v1559_v8  ;;  %v260_v11 = vsel %vm259_vm13, %v258_v61, 0  ;;  %vm1476_vm0 = vcmp.eq.s32.totalorder %v2757_v5, 2  ;;  %v1570_v35 = vsel %vm2798_vm8, 0, %v1568_v14 }
 0x126   :  { %v256_v32 = vor.u32 8388608, %v2776_v30  ;;  %v262_v50 = vand.u32 31, %v260_v11  ;;  %v1563_v46 = vcvt.s32.f32 %v1556_v45  ;;  %v753_v41 = vmul.u32 %v2772_v9, %v737_v2 }
 0x127   :  { %v2017_v37 = vpop.eup %2016  ;;  %v1561_v38 = vand.u32 2147483647, %v1560_v10  ;;  %vm755_vm1 = vc.u32 %v2816_v36, %v2821_v25  ;;  %v756_v39 = vadd.s32 1, %v2822_v40  ;;  %v1151_v1 = vand.u32 2139095040, %v2763_v15 }
 0x128   :  { %v2019_v54 = vpop.eup %2018  ;;  %v1477_v62 = vxor.u32 2147483648, %v2017_v37  ;;  %v263_v16 = vsub.s32 32, %v262_v50  ;;  %v2836_v59 = vshrl.u32 %v260_v11, 5  ;;  %v265_v30 = vshll.u32 %v2095_v60, %v262_v50 }
 0x129   :  { %v1474_v53 = vxor.u32 2147483648, %v2019_v54  ;;  %v1564_v4 = vmul.f32 %v1563_v46, %v1561_v38  ;;  %v757_v9 = vsel %vm755_vm1, %v756_v39, %v2822_v40  ;;  %v268_v34 = vshll.u32 %v2092_v49, %v262_v50 }
 0x12a   :  { %v1478_v7 = vsel %vm1476_vm0, %v1477_v62, %v2019_v54  ;;  %v266_v29 = vshrl.u32 %v2092_v49, %v263_v16  ;;  %v758_v63 = vadd.s32 %v757_v9, %v753_v41  ;;  %v269_v26 = vshrl.u32 %v2093_v51, %v263_v16 }
 0x12b   :  { %v1475_v3 = vsel %vm1473_vm15, %v2017_v37, %v1474_v53  ;;  %v1565_v42 = vxor.u32 2147483648, %v1564_v4  ;;  %v271_v13 = vshll.u32 %v2093_v51, %v262_v50  ;;  %v272_v14 = vshrl.u32 %v2094_v57, %v263_v16 }
 0x12c   :  { %v1479_v33 = vsel %vm1472_vm14, %v1475_v3, %v1478_v7  ;;  %v267_v22 = vor.u32 %v266_v29, %v265_v30  ;;  %v759_v61 = vadd.s32 536870912, %v758_v63  ;;  %v274_v45 = vshll.u32 %v2094_v57, %v262_v50 }
 0x12d   :  { %v1480_v55 = vsel %vm1469_vm12, nan, %v1479_v33  ;;  %v1566_v48 = vsel %vm1483_vm5, %v1565_v42, %v1564_v4  ;;  %v270_v8 = vor.u32 %v269_v26, %v268_v34  ;;  %v273_v52 = vor.u32 %v272_v14, %v271_v13 }
 0x12e   :  { %1587 = vrot.lane.b32.xlu0 %v1480_v55, %s2100_s16  ;;  %v1569_v5 = vsel %vm2798_vm8, %v2193_v20, %v1566_v48  ;;  %v275_v2 = vshrl.u32 %v2096_v0, %v263_v16  ;;  %v760_v40 = vshrl.u32 %v759_v61, 30  ;;  %v277_v10 = vshll.u32 %v2096_v0, %v262_v50 }
 0x12f   :  { %2020 = vcosq.f32 %v1569_v5  ;;  %v278_v11 = vshrl.u32 %v2097_v6, %v263_v16  ;;  %v1574_v37 = vadd.s32 3, %v1570_v35  ;;  %v1152_v46 = vshrl.u32 %v1151_v1, 23 }
 0x130   :  { %2022 = vsinq.f32 %v1569_v5  ;;  %v276_v38 = vor.u32 %v275_v2, %v274_v45  ;;  %v761_v41 = vshll.u32 %v760_v40, 30  ;;  %vm280_vm2 = vcmp.lt.s32.totalorder %v2836_v59, 1 }
 0x131   :  { %v279_v54 = vor.u32 %v278_v11, %v277_v10  ;;  %vm283_vm3 = vcmp.lt.s32.totalorder %v2836_v59, 4  ;;  %vm282_vm4 = vcmp.lt.s32.totalorder %v2836_v59, 3  ;;  %v288_v62 = vsel %vm280_vm2, %v267_v22, %v270_v8 }
 0x132   :  { %v285_v58 = vsel %vm283_vm3, %v273_v52, 2102212464  ;;  %v289_v50 = vsel %vm283_vm3, %v276_v38, 920167782  ;;  %v2870_v39 = vsub.s32 %v758_v63, %v761_v41  ;;  %v264_v35 = vshrl.u32 %v2095_v60, %v263_v16 }
 0x133   :  { %vm281_vm5 = vcmp.lt.s32.totalorder %v2836_v59, 2  ;;  %v290_v1 = vsel %vm282_vm4, %v273_v52, %v289_v50  ;;  %v1575_v53 = vand.u32 3, %v1574_v37  ;;  %v292_v30 = vsel %vm280_vm2, %v270_v8, %v273_v52 }
 0x134   :  { %v291_v4 = vsel %vm281_vm5, %v288_v62, %v290_v1  ;;  %v296_v7 = vshll.u32 %v256_v32, 8  ;;  %v764_v9 = vsub.s32 0, %v2870_v39  ;;  %v284_v29 = vsel %vm280_vm2, %v264_v35, %v267_v22 }
 0x135   :  { %v286_v34 = vsel %vm282_vm4, %v270_v8, %v285_v58  ;;  %v293_v16 = vsel %vm283_vm3, %v279_v54, 1326507024  ;;  %v1885_v26 = vadd.s32 4294967169, %v1152_v46  ;;  %v2891_v32 = vshll.u32 %v2096_v0, %v2609_v24 }
 0x136   :  { %v294_v3 = vsel %vm282_vm4, %v276_v38, %v293_v16  ;;  %v2885_v42 = vmul.u32.u64.low %v296_v7, %v291_v4  ;;  %v2886_v63 = vmul.u32.u64.high %v296_v7, %v291_v4, %v2885_v42  ;;  %vm2895_vm6 = vcmp.le.f32.partialorder %v698_v44, 0.7853982 }
 0x137   :  { %v1870_v22 = vmin.u32 %v764_v9, %v2870_v39  ;;  %v295_v13 = vsel %vm281_vm5, %v292_v30, %v294_v3  ;;  %v1148_v48 = vand.u32 2147483647, %v2763_v15  ;;  %v1158_v61 = vadd.s32 1, %v1885_v26 }
 0x138   :  { %v2902_v14 = vmul.u32.u64.low %v296_v7, %v295_v13  ;;  %v2903_v55 = vmul.u32.u64.high %v296_v7, %v295_v13, %v2902_v14  ;;  %vm1573_vm7 = vweird.f32 %v2193_v20  ;;  %vm700_vm8 = vcmp.lt.s32.totalorder %v2163_v43, 0 }
 0x139   :  { %v766_v45 = vclz %v1870_v22  ;;  %v784_v44 = vsub.s32 4, %v760_v40  ;;  %v287_v5 = vsel %vm281_vm5, %v284_v29, %v286_v34  ;;  %vm1576_vm9 = vcmp.lt.s32.totalorder %v1575_v53, 2 }
 0x13a   :  { %v306_v8 = vadd.s32 1, %v2886_v63  ;;  %vm1159_vm10 = vcmp.gt.s32.totalorder %v1158_v61, 0  ;;  %v2912_v52 = vadd.f32 1.5707964, %v2146_v18  ;;  %vm1577_vm11 = vcmp.eq.s32.totalorder %v1575_v53, 0 }
 0x13b   :  { %vm1580_vm12 = vcmp.eq.s32.totalorder %v1575_v53, 2  ;;  %v1871_v2 = vadd.s32 4294967294, %v766_v45  ;;  %v1160_v10 = vsel %vm1159_vm10, %v1158_v61, 0  ;;  %v303_v37 = vmul.u32 %v296_v7, %v287_v5 }
 0x13c   :  { %v2021_v11 = vpop.eup %2020  ;;  %vm305_vm13 = vc.u32 %v2903_v55, %v2885_v42  ;;  %v1155_v59 = vand.u32 8388607, %v1148_v48  ;;  %v1162_v38 = vand.u32 31, %v1160_v10  ;;  %v785_v54 = vsel %vm700_vm8, %v784_v44, %v760_v40 }
 0x13d   :  { %v2023_v46 = vpop.eup %2022  ;;  %v1581_v41 = vxor.u32 2147483648, %v2021_v11  ;;  %vm1872_vm14 = vcmp.lt.s32.totalorder %v1871_v2, 0  ;;  %v307_v58 = vsel %vm305_vm13, %v306_v8, %v2886_v63  ;;  %v754_v30 = vadd.s32 %v2821_v25, %v2816_v36 }
 0x13e   :  { %v1578_v62 = vxor.u32 2147483648, %v2023_v46  ;;  %v769_v50 = vsel %vm1872_vm14, 0, %v1871_v2  ;;  %v308_v35 = vadd.s32 %v307_v58, %v303_v37  ;;  %v1163_v1 = vsub.s32 32, %v1162_v38 }
 0x13f   :  { %v1582_v4 = vsel %vm1580_vm12, %v1581_v41, %v2023_v46  ;;  %v770_v7 = vsub.s32 32, %v769_v50  ;;  %v774_v9 = vsub.s32 4294967266, %v769_v50  ;;  %v787_v34 = vsel %vm2895_vm6, 0, %v785_v54 }
 0x140   :  { %v1579_v29 = vsel %vm1577_vm11, %v2021_v11, %v1578_v62  ;;  %v309_v16 = vadd.s32 536870912, %v308_v35  ;;  %v1156_v40 = vor.u32 8388608, %v1155_v59  ;;  %v771_v63 = vshll.u32 %v2870_v39, %v769_v50 }
 0x141   :  { %v1583_v3 = vsel %vm1576_vm9, %v1579_v29, %v1582_v4  ;;  %v772_v26 = vshrl.u32 %v754_v30, %v770_v7  ;;  %v775_v22 = vadd.s32 127, %v774_v9  ;;  %v1166_v36 = vshrl.u32 %v2092_v49, %v1163_v1 }
 0x142   :  { %v1584_v13 = vsel %vm1573_vm7, nan, %v1583_v3  ;;  %v2931_v14 = vshrl.u32 %v309_v16, 30  ;;  %v1169_v25 = vshrl.u32 %v2093_v51, %v1163_v1  ;;  %v1165_v53 = vshll.u32 %v2095_v60, %v1162_v38 }
 0x143   :  { %1589 = vrot.lane.b32.xlu1 %v1584_v13, %s2100_s16  ;;  %v773_v61 = vor.u32 %v772_v26, %v771_v63  ;;  %v776_v45 = vshll.u32 %v775_v22, 23  ;;  %v355_v44 = vand.u32 2139095040, %v2912_v52  ;;  %v1168_v5 = vshll.u32 %v2092_v49, %v1162_v38 }
 0x144   :  { %v311_v39 = vshll.u32 %v2931_v14, 30  ;;  %v1171_v8 = vshll.u32 %v2093_v51, %v1162_v38  ;;  %v1172_v2 = vshrl.u32 %v2094_v57, %v1163_v1  ;;  %v1161_v37 = vshrl.u32 %v1160_v10, 5 }
 0x145   :  { %v777_v11 = vor.u32 4788187, %v776_v45  ;;  %v1174_v59 = vshll.u32 %v2094_v57, %v1162_v38  ;;  %v1175_v46 = vshrl.u32 %v2096_v0, %v1163_v1  ;;  %v1167_v54 = vor.u32 %v1166_v36, %v1165_v53 }
 0x146   :  { %v2944_v41 = vsub.s32 %v308_v35, %v311_v39  ;;  %v1170_v58 = vor.u32 %v1169_v25, %v1168_v5  ;;  %v1173_v62 = vor.u32 %v1172_v2, %v1171_v8  ;;  %v780_v4 = vcvt.s32.f32 %v773_v61 }
 0x147   :  { %v778_v50 = vand.u32 2147483647, %v777_v11  ;;  %v1176_v30 = vor.u32 %v1175_v46, %v1174_v59  ;;  %v1178_v7 = vshrl.u32 %v2097_v6, %v1163_v1  ;;  %v791_v9 = vadd.s32 3, %v787_v34 }
 0x148   :  { %v314_v29 = vsub.s32 0, %v2944_v41  ;;  %v1177_v16 = vshll.u32 %v2096_v0, %v1162_v38  ;;  %v352_v10 = vand.u32 2147483647, %v2912_v52  ;;  %v1164_v63 = vshrl.u32 %v2095_v60, %v1163_v1 }
 0x149   :  { %v781_v3 = vmul.f32 %v780_v4, %v778_v50  ;;  %vm1183_vm15 = vcmp.lt.s32.totalorder %v1161_v37, 4  ;;  %v1196_v35 = vshll.u32 %v1156_v40, 8  ;;  %vm1180_vm0 = vcmp.lt.s32.totalorder %v1161_v37, 1 }
 0x14a   :  { %v1854_v26 = vmin.u32 %v314_v29, %v2944_v41  ;;  %v1179_v22 = vor.u32 %v1178_v7, %v1177_v16  ;;  %v1185_v13 = vsel %vm1183_vm15, %v1173_v62, 2102212464  ;;  %v1188_v25 = vsel %vm1180_vm0, %v1167_v54, %v1170_v58 }
 0x14b   :  { %v782_v36 = vxor.u32 2147483648, %v781_v3  ;;  %v1189_v34 = vsel %vm1183_vm15, %v1176_v30, 920167782  ;;  %v356_v61 = vshrl.u32 %v355_v44, 23  ;;  %vm1181_vm1 = vcmp.lt.s32.totalorder %v1161_v37, 2 }
 0x14c   :  { %v316_v45 = vclz %v1854_v26  ;;  %vm1182_vm2 = vcmp.lt.s32.totalorder %v1161_v37, 3  ;;  %v1184_v38 = vsel %vm1180_vm0, %v1164_v63, %v1167_v54  ;;  %vm150_vm3 = vcmp.gt.s32.totalorder %v2726_v28, 0 }
 0x14d   :  { %v783_v1 = vsel %vm700_vm8, %v782_v36, %v781_v3  ;;  %v1186_v40 = vsel %vm1182_vm2, %v1170_v58, %v1185_v13  ;;  %v1190_v53 = vsel %vm1182_vm2, %v1173_v62, %v1189_v34  ;;  %v1192_v39 = vsel %vm1180_vm0, %v1170_v58, %v1173_v62 }
 0x14e   :  { %v786_v5 = vsel %vm2895_vm6, %v2163_v43, %v783_v1  ;;  %vm2962_vm4 = vcmp.le.f32.partialorder %v248_v31, 0.7853982  ;;  %v1855_v8 = vadd.s32 4294967294, %v316_v45  ;;  %v1191_v2 = vsel %vm1181_vm1, %v1188_v25, %v1190_v53 }
 0x14f   :  { %v1193_v11 = vsel %vm1183_vm15, %v1179_v22, 1326507024  ;;  %2024 = vcosq.f32 %v786_v5  ;;  %v2968_v46 = vmul.u32.u64.low %v1196_v35, %v1191_v2  ;;  %v2969_v54 = vmul.u32.u64.high %v1196_v35, %v1191_v2, %v2968_v46 }
 0x150   :  { %v1194_v59 = vsel %vm1182_vm2, %v1176_v30, %v1193_v11  ;;  %2026 = vsinq.f32 %v786_v5  ;;  %vm1856_vm5 = vcmp.lt.s32.totalorder %v1855_v8, 0  ;;  %v334_v33 = vsub.s32 4, %v2931_v14 }
 0x151   :  { %v1195_v31 = vsel %vm1181_vm1, %v1192_v39, %v1194_v59  ;;  %v319_v58 = vsel %vm1856_vm5, 0, %v1855_v8  ;;  %v1857_v4 = vadd.s32 4294967169, %v356_v61  ;;  %v304_v7 = vadd.s32 %v2885_v42, %v2903_v55 }
 0x152   :  { %v2974_v62 = vmul.u32.u64.low %v1196_v35, %v1195_v31  ;;  %v2975_v50 = vmul.u32.u64.high %v1196_v35, %v1195_v31, %v2974_v62  ;;  %v320_v29 = vsub.s32 32, %v319_v58  ;;  %v324_v30 = vsub.s32 4294967266, %v319_v58 }
 0x153   :  { %v1187_v16 = vsel %vm1181_vm1, %v1184_v38, %v1186_v40  ;;  %v2980_v3 = vand.u32 3, %v791_v9  ;;  %vm250_vm6 = vcmp.lt.s32.totalorder %v2744_v27, 0  ;;  %v1206_v63 = vadd.s32 1, %v2969_v54 }
 0x154   :  { %v362_v26 = vadd.s32 1, %v1857_v4  ;;  %v321_v22 = vshll.u32 %v2944_v41, %v319_v58  ;;  %v322_v13 = vshrl.u32 %v304_v7, %v320_v29  ;;  %v325_v36 = vadd.s32 127, %v324_v30 }
 0x155   :  { %v335_v25 = vsel %vm250_vm6, %v334_v33, %v2931_v14  ;;  %v1203_v42 = vmul.u32 %v1196_v35, %v1187_v16  ;;  %vm1205_vm7 = vc.u32 %v2975_v50, %v2968_v46  ;;  %v2992_v55 = vand.u32 8388607, %v352_v10 }
 0x156   :  { %vm363_vm8 = vcmp.gt.s32.totalorder %v362_v26, 0  ;;  %v323_v37 = vor.u32 %v322_v13, %v321_v22  ;;  %v326_v9 = vshll.u32 %v325_v36, 23  ;;  %v1207_v34 = vsel %vm1205_vm7, %v1206_v63, %v2969_v54 }
 0x157   :  { %v364_v41 = vsel %vm363_vm8, %v362_v26, 0  ;;  %v2997_v61 = vshrl.u32 %v2096_v0, %v2719_v21  ;;  %v337_v14 = vsel %vm2962_vm4, 0, %v335_v25  ;;  %v1208_v35 = vadd.s32 %v1207_v34, %v1203_v42 }
 0x158   :  { %v366_v45 = vand.u32 31, %v364_v41  ;;  %v3003_v38 = vshrl.u32 %v2097_v6, %v2719_v21  ;;  %v3008_v1 = vsel %vm150_vm3, %v2726_v28, 0  ;;  %vm793_vm9 = vcmp.lt.s32.totalorder %v2980_v3, 2 }
 0x159   :  { %v327_v40 = vor.u32 4788187, %v326_v9  ;;  %vm790_vm10 = vweird.f32 %v2163_v43  ;;  %vm794_vm11 = vcmp.eq.s32.totalorder %v2980_v3, 0  ;;  %vm797_vm12 = vcmp.eq.s32.totalorder %v2980_v3, 2 }
 0x15a   :  { %v1209_v53 = vadd.s32 536870912, %v1208_v35  ;;  %v367_v39 = vsub.s32 32, %v366_v45  ;;  %v330_v8 = vcvt.s32.f32 %v323_v37  ;;  %v341_v2 = vadd.s32 3, %v337_v14 }
 0x15b   :  { %v328_v5 = vand.u32 2147483647, %v327_v40  ;;  %v360_v11 = vor.u32 8388608, %v2992_v55  ;;  %v3015_v54 = vshrl.u32 %v364_v41, 5  ;;  %v369_v28 = vshll.u32 %v2095_v60, %v366_v45 }
 0x15c   :  { %v1210_v59 = vshrl.u32 %v1209_v53, 30  ;;  %v372_v33 = vshll.u32 %v2092_v49, %v366_v45  ;;  %v2025_v31 = vpop.eup %2024  ;;  %v370_v62 = vshrl.u32 %v2092_v49, %v367_v39  ;;  %v373_v4 = vshrl.u32 %v2093_v51, %v367_v39 }
 0x15d   :  { %v331_v58 = vmul.f32 %v330_v8, %v328_v5  ;;  %v375_v7 = vshll.u32 %v2093_v51, %v366_v45  ;;  %v2027_v29 = vpop.eup %2026  ;;  %v798_v30 = vxor.u32 2147483648, %v2025_v31  ;;  %vm1150_vm13 = vcmp.lt.s32.totalorder %v2763_v15, 0 }
 0x15e   :  { %v1211_v16 = vshll.u32 %v1210_v59, 30  ;;  %v376_v63 = vshrl.u32 %v2094_v57, %v367_v39  ;;  %v378_v26 = vshll.u32 %v2094_v57, %v366_v45  ;;  %v795_v22 = vxor.u32 2147483648, %v2027_v29 }
 0x15f   :  { %v332_v13 = vxor.u32 2147483648, %v331_v58  ;;  %v379_v36 = vshrl.u32 %v2096_v0, %v367_v39  ;;  %v382_v25 = vshrl.u32 %v2097_v6, %v367_v39  ;;  %v799_v42 = vsel %vm797_vm12, %v798_v30, %v2027_v29 }
 0x160   :  { %v3029_v55 = vsub.s32 %v1208_v35, %v1211_v16  ;;  %v1234_v37 = vsub.s32 4, %v1210_v59  ;;  %v381_v9 = vshll.u32 %v2096_v0, %v366_v45  ;;  %v796_v34 = vsel %vm794_vm11, %v2025_v31, %v795_v22 }
 0x161   :  { %v333_v41 = vsel %vm250_vm6, %v332_v13, %v331_v58  ;;  %v371_v14 = vor.u32 %v370_v62, %v369_v28  ;;  %v374_v40 = vor.u32 %v373_v4, %v372_v33  ;;  %v800_v53 = vsel %vm793_vm9, %v796_v34, %v799_v42 }
 0x162   :  { %v336_v5 = vsel %vm2962_vm4, %v2744_v27, %v333_v41  ;;  %v1214_v35 = vsub.s32 0, %v3029_v55  ;;  %v377_v8 = vor.u32 %v376_v63, %v375_v7  ;;  %v801_v45 = vsel %vm790_vm10, nan, %v800_v53 }
 0x163   :  { %2028 = vcosq.f32 %v336_v5  ;;  %v380_v31 = vor.u32 %v379_v36, %v378_v26  ;;  %v383_v29 = vor.u32 %v382_v25, %v381_v9  ;;  %908 = vrot.lane.b32.xlu0 %v801_v45, %s2101_s17  ;;  %v3045_v28 = vand.u32 3, %v341_v2 }
 0x164   :  { %2030 = vsinq.f32 %v336_v5  ;;  %v1886_v3 = vmin.u32 %v1214_v35, %v3029_v55  ;;  %v3049_v44 = vadd.f32 1.5707964, %v2190_v19  ;;  %v368_v33 = vshrl.u32 %v2095_v60, %v367_v39 }
 0x165   :  { %vm384_vm14 = vcmp.lt.s32.totalorder %v3015_v54, 1  ;;  %vm386_vm15 = vcmp.lt.s32.totalorder %v3015_v54, 3  ;;  %v400_v43 = vshll.u32 %v360_v11, 8  ;;  %vm387_vm0 = vcmp.lt.s32.totalorder %v3015_v54, 4 }
 0x166   :  { %v1216_v58 = vclz %v1886_v3  ;;  %v392_v62 = vsel %vm384_vm14, %v371_v14, %v374_v40  ;;  %v396_v4 = vsel %vm384_vm14, %v374_v40, %v377_v8  ;;  %v1235_v2 = vsel %vm1150_vm13, %v1234_v37, %v1210_v59 }
 0x167   :  { %v389_v7 = vsel %vm387_vm0, %v377_v8, 2102212464  ;;  %v393_v30 = vsel %vm387_vm0, %v380_v31, 920167782  ;;  %v397_v16 = vsel %vm387_vm0, %v383_v29, 1326507024  ;;  %v388_v63 = vsel %vm384_vm14, %v368_v33, %v371_v14 }
 0x168   :  { %v1887_v19 = vadd.s32 4294967294, %v1216_v58  ;;  %vm385_vm1 = vcmp.lt.s32.totalorder %v3015_v54, 2  ;;  %v394_v39 = vsel %vm386_vm15, %v377_v8, %v393_v30  ;;  %v398_v11 = vsel %vm386_vm15, %v380_v31, %v397_v16 }
 0x169   :  { %v395_v26 = vsel %vm385_vm1, %v392_v62, %v394_v39  ;;  %v399_v22 = vsel %vm385_vm1, %v396_v4, %v398_v11  ;;  %v1601_v59 = vand.u32 2139095040, %v3049_v44  ;;  %v390_v13 = vsel %vm386_vm15, %v374_v40, %v389_v7 }
 0x16a   :  { %vm1888_vm2 = vcmp.lt.s32.totalorder %v1887_v19, 0  ;;  %v3069_v36 = vmul.u32.u64.low %v400_v43, %v399_v22  ;;  %v3070_v25 = vmul.u32.u64.high %v400_v43, %v399_v22, %v3069_v36  ;;  %vm3078_vm3 = vcmp.le.f32.partialorder %v1148_v48, 0.7853982 }
 0x16b   :  { %v1219_v42 = vsel %vm1888_vm2, 0, %v1887_v19  ;;  %v3072_v37 = vmul.u32.u64.low %v400_v43, %v395_v26  ;;  %v3073_v9 = vmul.u32.u64.high %v400_v43, %v395_v26, %v3072_v37  ;;  %v1602_v34 = vshrl.u32 %v1601_v59, 23 }
 0x16c   :  { %v1204_v14 = vadd.s32 %v2968_v46, %v2975_v50  ;;  %v1220_v53 = vsub.s32 32, %v1219_v42  ;;  %v1224_v40 = vsub.s32 4294967266, %v1219_v42  ;;  %vm340_vm4 = vweird.f32 %v2744_v27 }
 0x16d   :  { %v1237_v5 = vsel %vm3078_vm3, 0, %v1235_v2  ;;  %v391_v35 = vsel %vm385_vm1, %v388_v63, %v390_v13  ;;  %v1901_v8 = vadd.s32 4294967169, %v1602_v34  ;;  %v3090_v45 = vadd.f32 1.5707964, %v2143_v17 }
 0x16e   :  { %v1221_v48 = vshll.u32 %v3029_v55, %v1219_v42  ;;  %v1222_v31 = vshrl.u32 %v1204_v14, %v1220_v53  ;;  %v1225_v29 = vadd.s32 127, %v1224_v40  ;;  %vm409_vm5 = vc.u32 %v3070_v25, %v3072_v37 }
 0x16f   :  { %vm343_vm6 = vcmp.lt.s32.totalorder %v3045_v28, 2  ;;  %v410_v46 = vadd.s32 1, %v3073_v9  ;;  %v1598_v50 = vand.u32 2147483647, %v3049_v44  ;;  %v1608_v3 = vadd.s32 1, %v1901_v8 }
 0x170   :  { %v2029_v54 = vpop.eup %2028  ;;  %vm347_vm7 = vcmp.eq.s32.totalorder %v3045_v28, 2  ;;  %v1223_v33 = vor.u32 %v1222_v31, %v1221_v48  ;;  %v1226_v17 = vshll.u32 %v1225_v29, 23  ;;  %v407_v58 = vmul.u32 %v400_v43, %v391_v35 }
 0x171   :  { %v2031_v62 = vpop.eup %2030  ;;  %v348_v55 = vxor.u32 2147483648, %v2029_v54  ;;  %v1241_v4 = vadd.s32 3, %v1237_v5  ;;  %v411_v2 = vsel %vm409_vm5, %v410_v46, %v3073_v9  ;;  %vm1609_vm8 = vcmp.gt.s32.totalorder %v1608_v3, 0 }
 0x172   :  { %v345_v7 = vxor.u32 2147483648, %v2031_v62  ;;  %v1227_v30 = vor.u32 4788187, %v1226_v17  ;;  %v412_v16 = vadd.s32 %v411_v2, %v407_v58  ;;  %v805_v19 = vand.u32 2139095040, %v3090_v45 }
 0x173   :  { %vm344_vm9 = vcmp.eq.s32.totalorder %v3045_v28, 0  ;;  %v349_v39 = vsel %vm347_vm7, %v348_v55, %v2031_v62  ;;  %v1605_v11 = vand.u32 8388607, %v1598_v50  ;;  %v1610_v63 = vsel %vm1609_vm8, %v1608_v3, 0 }
 0x174   :  { %v346_v26 = vsel %vm344_vm9, %v2029_v54, %v345_v7  ;;  %v1228_v43 = vand.u32 2147483647, %v1227_v30  ;;  %v1230_v22 = vcvt.s32.f32 %v1223_v33  ;;  %v413_v59 = vadd.s32 536870912, %v412_v16 }
 0x175   :  { %v350_v13 = vsel %vm343_vm6, %v346_v26, %v349_v39  ;;  %v3106_v36 = vand.u32 3, %v1241_v4  ;;  %v1612_v42 = vand.u32 31, %v1610_v63  ;;  %v802_v9 = vand.u32 2147483647, %v3090_v45 }
 0x176   :  { %v351_v34 = vsel %vm340_vm4, nan, %v350_v13  ;;  %v1231_v14 = vmul.f32 %v1230_v22, %v1228_v43  ;;  %v414_v53 = vshrl.u32 %v413_v59, 30  ;;  %v806_v40 = vshrl.u32 %v805_v19, 23 }
 0x177   :  { %458 = vrot.lane.b32.xlu1 %v351_v34, %s2102_s18  ;;  %v1606_v5 = vor.u32 8388608, %v1605_v11  ;;  %v3112_v35 = vshrl.u32 %v1610_v63, 5  ;;  %v1613_v8 = vsub.s32 32, %v1612_v42  ;;  %v1615_v28 = vshll.u32 %v2095_v60, %v1612_v42 }
 0x178   :  { %v1232_v48 = vxor.u32 2147483648, %v1231_v14  ;;  %v415_v31 = vshll.u32 %v414_v53, 30  ;;  %v1618_v29 = vshll.u32 %v2092_v49, %v1612_v42  ;;  %v1621_v46 = vshll.u32 %v2093_v51, %v1612_v42 }
 0x179   :  { %vm354_vm10 = vcmp.lt.s32.totalorder %v2912_v52, 0  ;;  %v1616_v27 = vshrl.u32 %v2092_v49, %v1613_v8  ;;  %v1619_v3 = vshrl.u32 %v2093_v51, %v1613_v8  ;;  %v1622_v54 = vshrl.u32 %v2094_v57, %v1613_v8 }
 0x17a   :  { %v1624_v33 = vshll.u32 %v2094_v57, %v1612_v42  ;;  %v1233_v17 = vsel %vm1150_vm13, %v1232_v48, %v1231_v14  ;;  %v3124_v58 = vsub.s32 %v412_v16, %v415_v31  ;;  %v1625_v62 = vshrl.u32 %v2096_v0, %v1613_v8 }
 0x17b   :  { %v1873_v55 = vadd.s32 4294967169, %v806_v40  ;;  %v1236_v4 = vsel %vm3078_vm3, %v2763_v15, %v1233_v17  ;;  %v1617_v2 = vor.u32 %v1616_v27, %v1615_v28  ;;  %vm1630_vm11 = vcmp.lt.s32.totalorder %v3112_v35, 1 }
 0x17c   :  { %v809_v7 = vand.u32 8388607, %v802_v9  ;;  %2032 = vcosq.f32 %v1236_v4  ;;  %v418_v30 = vsub.s32 0, %v3124_v58  ;;  %v1620_v19 = vor.u32 %v1619_v3, %v1618_v29 }
 0x17d   :  { %v1623_v39 = vor.u32 %v1622_v54, %v1621_v46  ;;  %2034 = vsinq.f32 %v1236_v4  ;;  %v1626_v16 = vor.u32 %v1625_v62, %v1624_v33  ;;  %v1627_v11 = vshll.u32 %v2096_v0, %v1612_v42 }
 0x17e   :  { %v1628_v63 = vshrl.u32 %v2097_v6, %v1613_v8  ;;  %vm3138_vm12 = vcmp.le.f32.partialorder %v352_v10, 0.7853982  ;;  %v1858_v26 = vmin.u32 %v418_v30, %v3124_v58  ;;  %v438_v43 = vsub.s32 4, %v414_v53 }
 0x17f   :  { %v1646_v22 = vshll.u32 %v1606_v5, 8  ;;  %v812_v59 = vadd.s32 1, %v1873_v55  ;;  %v1614_v13 = vshrl.u32 %v2095_v60, %v1613_v8  ;;  %vm1632_vm13 = vcmp.lt.s32.totalorder %v3112_v35, 3 }
 0x180   :  { %v1629_v34 = vor.u32 %v1628_v63, %v1627_v11  ;;  %vm1633_vm14 = vcmp.lt.s32.totalorder %v3112_v35, 4  ;;  %v420_v42 = vclz %v1858_v26  ;;  %vm1631_vm15 = vcmp.lt.s32.totalorder %v3112_v35, 2 }
 0x181   :  { %v1638_v10 = vsel %vm1630_vm11, %v1617_v2, %v1620_v19  ;;  %v810_v14 = vor.u32 8388608, %v809_v7  ;;  %v1635_v40 = vsel %vm1633_vm14, %v1623_v39, 2102212464  ;;  %v1639_v28 = vsel %vm1633_vm14, %v1626_v16, 920167782 }
 0x182   :  { %v1642_v5 = vsel %vm1630_vm11, %v1620_v19, %v1623_v39  ;;  %v1643_v48 = vsel %vm1633_vm14, %v1629_v34, 1326507024  ;;  %v1859_v31 = vadd.s32 4294967294, %v420_v42  ;;  %v439_v8 = vsel %vm354_vm10, %v438_v43, %v414_v53 }
 0x183   :  { %v1640_v29 = vsel %vm1632_vm13, %v1623_v39, %v1639_v28  ;;  %v1644_v46 = vsel %vm1632_vm13, %v1626_v16, %v1643_v48  ;;  %v1634_v27 = vsel %vm1630_vm11, %v1614_v13, %v1617_v2  ;;  %vm813_vm0 = vcmp.gt.s32.totalorder %v812_v59, 0 }
 0x184   :  { %v1641_v3 = vsel %vm1631_vm15, %v1638_v10, %v1640_v29  ;;  %v1645_v54 = vsel %vm1631_vm15, %v1642_v5, %v1644_v46  ;;  %vm1860_vm1 = vcmp.lt.s32.totalorder %v1859_v31, 0  ;;  %v1636_v53 = vsel %vm1632_vm13, %v1620_v19, %v1635_v40 }
 0x185   :  { %v3165_v33 = vmul.u32.u64.low %v1646_v22, %v1645_v54  ;;  %v3166_v17 = vmul.u32.u64.high %v1646_v22, %v1645_v54, %v3165_v33  ;;  %v423_v62 = vsel %vm1860_vm1, 0, %v1859_v31  ;;  %v814_v2 = vsel %vm813_vm0, %v812_v59, 0 }
 0x186   :  { %v3168_v55 = vmul.u32.u64.low %v1646_v22, %v1641_v3  ;;  %v3169_v4 = vmul.u32.u64.high %v1646_v22, %v1641_v3, %v3168_v55  ;;  %vm1240_vm2 = vweird.f32 %v2763_v15  ;;  %vm1243_vm3 = vcmp.lt.s32.totalorder %v3106_v36, 2 }
 0x187   :  { %v408_v7 = vadd.s32 %v3072_v37, %v3070_v25  ;;  %v424_v30 = vsub.s32 32, %v423_v62  ;;  %v428_v39 = vsub.s32 4294967266, %v423_v62  ;;  %vm1244_vm4 = vcmp.eq.s32.totalorder %v3106_v36, 0 }
 0x188   :  { %v441_v19 = vsel %vm3138_vm12, 0, %v439_v8  ;;  %v1637_v16 = vsel %vm1631_vm15, %v1634_v27, %v1636_v53  ;;  %v816_v11 = vand.u32 31, %v814_v2  ;;  %v425_v63 = vshll.u32 %v3124_v58, %v423_v62 }
 0x189   :  { %v426_v26 = vshrl.u32 %v408_v7, %v424_v30  ;;  %v429_v43 = vadd.s32 127, %v428_v39  ;;  %vm1655_vm5 = vc.u32 %v3166_v17, %v3168_v55  ;;  %v2033_v59 = vpop.eup %2032  ;;  %vm1247_vm6 = vcmp.eq.s32.totalorder %v3106_v36, 2 }
 0x18a   :  { %v1656_v25 = vadd.s32 1, %v3169_v4  ;;  %v817_v37 = vsub.s32 32, %v816_v11  ;;  %v3186_v13 = vshll.u32 %v810_v14, 8  ;;  %v2035_v34 = vpop.eup %2034  ;;  %v1248_v42 = vxor.u32 2147483648, %v2033_v59 }
 0x18b   :  { %v427_v35 = vor.u32 %v426_v26, %v425_v63  ;;  %v430_v10 = vshll.u32 %v429_v43, 23  ;;  %v1653_v40 = vmul.u32 %v1646_v22, %v1637_v16  ;;  %v1245_v28 = vxor.u32 2147483648, %v2035_v34 }
 0x18c   :  { %v445_v58 = vadd.s32 3, %v441_v19  ;;  %v1657_v5 = vsel %vm1655_vm5, %v1656_v25, %v3169_v4  ;;  %v3189_v48 = vshrl.u32 %v814_v2, 5  ;;  %v1249_v31 = vsel %vm1247_vm6, %v1248_v42, %v2035_v34 }
 0x18d   :  { %v431_v8 = vor.u32 4788187, %v430_v10  ;;  %v1658_v29 = vadd.s32 %v1657_v5, %v1653_v40  ;;  %v819_v46 = vshll.u32 %v2095_v60, %v816_v11  ;;  %v1246_v14 = vsel %vm1244_vm4, %v2033_v59, %v1245_v28 }
 0x18e   :  { %v434_v27 = vcvt.s32.f32 %v427_v35  ;;  %v820_v3 = vshrl.u32 %v2092_v49, %v817_v37  ;;  %v823_v54 = vshrl.u32 %v2093_v51, %v817_v37  ;;  %v1250_v22 = vsel %vm1243_vm3, %v1246_v14, %v1249_v31 }
 0x18f   :  { %v432_v53 = vand.u32 2147483647, %v431_v8  ;;  %v1659_v33 = vadd.s32 536870912, %v1658_v29  ;;  %v826_v62 = vshrl.u32 %v2094_v57, %v817_v37  ;;  %v1251_v4 = vsel %vm1240_vm2, nan, %v1250_v22 }
 0x190   :  { %v822_v2 = vshll.u32 %v2092_v49, %v816_v11  ;;  %v828_v7 = vshll.u32 %v2094_v57, %v816_v11  ;;  %v829_v30 = vshrl.u32 %v2096_v0, %v817_v37  ;;  %1358 = vrot.lane.b32.xlu0 %v1251_v4, %s2103_s19  ;;  %v825_v36 = vshll.u32 %v2093_v51, %v816_v11 }
 0x191   :  { %v435_v39 = vmul.f32 %v434_v27, %v432_v53  ;;  %v1660_v19 = vshrl.u32 %v1659_v33, 30  ;;  %v832_v16 = vshrl.u32 %v2097_v6, %v817_v37  ;;  %v821_v63 = vor.u32 %v820_v3, %v819_v46 }
 0x192   :  { %v824_v26 = vor.u32 %v823_v54, %v822_v2  ;;  %v830_v43 = vor.u32 %v829_v30, %v828_v7  ;;  %v831_v15 = vshll.u32 %v2096_v0, %v816_v11  ;;  %v827_v34 = vor.u32 %v826_v62, %v825_v36 }
 0x193   :  { %v436_v59 = vxor.u32 2147483648, %v435_v39  ;;  %v1661_v25 = vshll.u32 %v1660_v19, 30  ;;  %v3209_v42 = vadd.f32 1.5707964, %v2150_v23  ;;  %v818_v35 = vshrl.u32 %v2095_v60, %v817_v37 }
 0x194   :  { %v833_v10 = vor.u32 %v832_v16, %v831_v15  ;;  %vm834_vm7 = vcmp.lt.s32.totalorder %v3189_v48, 1  ;;  %v3214_v40 = vadd.f32 1.5707964, %v2193_v20  ;;  %vm835_vm8 = vcmp.lt.s32.totalorder %v3189_v48, 2 }
 0x195   :  { %v437_v28 = vsel %vm354_vm10, %v436_v59, %v435_v39  ;;  %v3218_v5 = vsub.s32 %v1658_v29, %v1661_v25  ;;  %vm837_vm9 = vcmp.lt.s32.totalorder %v3189_v48, 4  ;;  %vm836_vm11 = vcmp.lt.s32.totalorder %v3189_v48, 3 }
 0x196   :  { %v440_v23 = vsel %vm3138_vm12, %v2912_v52, %v437_v28  ;;  %v842_v11 = vsel %vm834_vm7, %v821_v63, %v824_v26  ;;  %v843_v20 = vsel %vm837_vm9, %v830_v43, 920167782  ;;  %v839_v31 = vsel %vm837_vm9, %v827_v34, 2102212464 }
 0x197   :  { %2036 = vcosq.f32 %v440_v23  ;;  %v1664_v37 = vsub.s32 0, %v3218_v5  ;;  %v846_v8 = vsel %vm834_vm7, %v824_v26, %v827_v34  ;;  %v1684_v29 = vsub.s32 4, %v1660_v19 }
 0x198   :  { %2038 = vsinq.f32 %v440_v23  ;;  %v844_v46 = vsel %vm836_vm11, %v827_v34, %v843_v20  ;;  %v847_v14 = vsel %vm837_vm9, %v833_v10, 1326507024  ;;  %v838_v27 = vsel %vm834_vm7, %v818_v35, %v821_v63 }
 0x199   :  { %v1902_v41 = vmin.u32 %v1664_v37, %v3218_v5  ;;  %v845_v3 = vsel %vm835_vm8, %v842_v11, %v844_v46  ;;  %v848_v54 = vsel %vm836_vm11, %v830_v43, %v847_v14  ;;  %v840_v22 = vsel %vm836_vm11, %v824_v26, %v839_v31 }
 0x19a   :  { %v849_v53 = vsel %vm835_vm8, %v846_v8, %v848_v54  ;;  %v3239_v33 = vmul.u32.u64.low %v3186_v13, %v845_v3  ;;  %v3240_v62 = vmul.u32.u64.high %v3186_v13, %v845_v3, %v3239_v33  ;;  %v3244_v4 = vshrl.u32 %v2370_v47, 5 }
 0x19b   :  { %v3247_v2 = vand.u32 31, %v3008_v1  ;;  %v446_v7 = vand.u32 3, %v445_v58  ;;  %v1666_v30 = vclz %v1902_v41  ;;  %v3251_v39 = vor.u32 %v2997_v61, %v2723_v56 }
 0x19c   :  { %v66_v36 = vor.u32 %v3003_v38, %v2891_v32  ;;  %v3256_v16 = vmul.u32.u64.low %v3186_v13, %v849_v53  ;;  %v3257_v63 = vmul.u32.u64.high %v3186_v13, %v849_v53, %v3256_v16  ;;  %vm1600_vm10 = vcmp.lt.s32.totalorder %v3049_v44, 0 }
 0x19d   :  { %v1903_v47 = vadd.s32 4294967294, %v1666_v30  ;;  %v841_v26 = vsel %vm835_vm8, %v838_v27, %v840_v22  ;;  %v1255_v58 = vand.u32 2139095040, %v3209_v42  ;;  %v1685_v43 = vsel %vm1600_vm10, %v1684_v29, %v1660_v19 }
 0x19e   :  { %v860_v56 = vadd.s32 1, %v3240_v62  ;;  %v1252_v61 = vand.u32 2147483647, %v3209_v42  ;;  %v1705_v15 = vand.u32 2139095040, %v3214_v40  ;;  %vm448_vm12 = vcmp.eq.s32.totalorder %v446_v7, 0 }
 0x19f   :  { %vm3270_vm13 = vcmp.le.f32.partialorder %v1598_v50, 0.7853982  ;;  %vm1904_vm14 = vcmp.lt.s32.totalorder %v1903_v47, 0  ;;  %v1256_v48 = vshrl.u32 %v1255_v58, 23  ;;  %vm447_vm15 = vcmp.lt.s32.totalorder %v446_v7, 2 }
 0x1a0   :  { %v1654_v25 = vadd.s32 %v3168_v55, %v3166_v17  ;;  %v1669_v19 = vsel %vm1904_vm14, 0, %v1903_v47  ;;  %v857_v34 = vmul.u32 %v3186_v13, %v841_v26  ;;  %vm859_vm0 = vc.u32 %v3257_v63, %v3239_v33 }
 0x1a1   :  { %vm444_vm1 = vweird.f32 %v2912_v52  ;;  %v1670_v35 = vsub.s32 32, %v1669_v19  ;;  %v1674_v10 = vsub.s32 4294967266, %v1669_v19  ;;  %v1687_v50 = vsel %vm3270_vm13, 0, %v1685_v43 }
 0x1a2   :  { %v861_v28 = vsel %vm859_vm0, %v860_v56, %v3240_v62  ;;  %v1889_v11 = vadd.s32 4294967169, %v1256_v48  ;;  %v1259_v17 = vand.u32 8388607, %v1252_v61  ;;  %v1706_v55 = vshrl.u32 %v1705_v15, 23 }
 0x1a3   :  { %v862_v23 = vadd.s32 %v861_v28, %v857_v34  ;;  %vm451_vm2 = vcmp.eq.s32.totalorder %v446_v7, 2  ;;  %v1671_v13 = vshll.u32 %v3218_v5, %v1669_v19  ;;  %v1672_v20 = vshrl.u32 %v1654_v25, %v1670_v35 }
 0x1a4   :  { %v1675_v37 = vadd.s32 127, %v1674_v10  ;;  %vm804_vm3 = vcmp.lt.s32.totalorder %v3090_v45, 0  ;;  %v2037_v31 = vpop.eup %2036  ;;  %v1691_v8 = vadd.s32 3, %v1687_v50  ;;  %v1262_v46 = vadd.s32 1, %v1889_v11 }
 0x1a5   :  { %v863_v29 = vadd.s32 536870912, %v862_v23  ;;  %v1905_v14 = vadd.s32 4294967169, %v1706_v55  ;;  %v2039_v41 = vpop.eup %2038  ;;  %v452_v27 = vxor.u32 2147483648, %v2037_v31  ;;  %v1673_v3 = vor.u32 %v1672_v20, %v1671_v13 }
 0x1a6   :  { %v1676_v54 = vshll.u32 %v1675_v37, 23  ;;  %v1702_v22 = vand.u32 2147483647, %v3214_v40  ;;  %v449_v53 = vxor.u32 2147483648, %v2039_v41  ;;  %v1260_v30 = vor.u32 8388608, %v1259_v17 }
 0x1a7   :  { %v864_v62 = vshrl.u32 %v863_v29, 30  ;;  %vm1263_vm4 = vcmp.gt.s32.totalorder %v1262_v46, 0  ;;  %v453_v5 = vsel %vm451_vm2, %v452_v27, %v2039_v41  ;;  %v3289_v26 = vadd.s32 1, %v1905_v14 }
 0x1a8   :  { %v1677_v16 = vor.u32 4788187, %v1676_v54  ;;  %v1264_v47 = vsel %vm1263_vm4, %v1262_v46, 0  ;;  %v450_v58 = vsel %vm448_vm12, %v2037_v31, %v449_v53  ;;  %v1680_v43 = vcvt.s32.f32 %v1673_v3 }
 0x1a9   :  { %v865_v56 = vshll.u32 %v864_v62, 30  ;;  %v888_v15 = vsub.s32 4, %v864_v62  ;;  %v454_v48 = vsel %vm447_vm15, %v450_v58, %v453_v5  ;;  %v3293_v19 = vshrl.u32 %v1264_v47, 5 }
 0x1aa   :  { %v1678_v25 = vand.u32 2147483647, %v1677_v16  ;;  %v1266_v34 = vand.u32 31, %v1264_v47  ;;  %v455_v35 = vsel %vm444_vm1, nan, %v454_v48  ;;  %v3297_v10 = vand.u32 3, %v1691_v8 }
 0x1ab   :  { %vm3301_vm5 = vcmp.le.f32.partialorder %v802_v9, 0.7853982  ;;  %v866_v28 = vsub.s32 %v862_v23, %v865_v56  ;;  %460 = vrot.lane.b32.xlu1 %v455_v35, %s2102_s18  ;;  %v858_v11 = vadd.s32 %v3239_v33, %v3257_v63  ;;  %v3308_v55 = vshll.u32 %v1260_v30, 8 }
 0x1ac   :  { %v1681_v7 = vmul.f32 %v1680_v43, %v1678_v25  ;;  %v1267_v17 = vsub.s32 32, %v1266_v34  ;;  %v3312_v13 = vsel %vm804_vm3, %v888_v15, %v864_v62  ;;  %v3316_v9 = vand.u32 8388607, %v1702_v22 }
 0x1ad   :  { %v868_v52 = vsub.s32 0, %v866_v28  ;;  %vm1713_vm6 = vcmp.gt.s32.totalorder %v3289_v26, 0  ;;  %vm1284_vm7 = vcmp.lt.s32.totalorder %v3293_v19, 1  ;;  %v1269_v63 = vshll.u32 %v2095_v60, %v1266_v34 }
 0x1ae   :  { %v1682_v23 = vxor.u32 2147483648, %v1681_v7  ;;  %v1270_v20 = vshrl.u32 %v2092_v49, %v1267_v17  ;;  %v1273_v37 = vshrl.u32 %v2093_v51, %v1267_v17  ;;  %v1272_v31 = vshll.u32 %v2092_v49, %v1266_v34 }
 0x1af   :  { %v1874_v33 = vmin.u32 %v868_v52, %v866_v28  ;;  %v1276_v8 = vshrl.u32 %v2094_v57, %v1267_v17  ;;  %v1275_v46 = vshll.u32 %v2093_v51, %v1266_v34  ;;  %v1278_v14 = vshll.u32 %v2094_v57, %v1266_v34 }
 0x1b0   :  { %v1683_v29 = vsel %vm1600_vm10, %v1682_v23, %v1681_v7  ;;  %v1279_v41 = vshrl.u32 %v2096_v0, %v1267_v17  ;;  %v1268_v54 = vshrl.u32 %v2095_v60, %v1267_v17  ;;  %v1271_v53 = vor.u32 %v1270_v20, %v1269_v63 }
 0x1b1   :  { %v1686_v27 = vsel %vm3270_vm13, %v3049_v44, %v1683_v29  ;;  %v870_v3 = vclz %v1874_v33  ;;  %v1274_v62 = vor.u32 %v1273_v37, %v1272_v31  ;;  %v1277_v30 = vor.u32 %v1276_v8, %v1275_v46 }
 0x1b2   :  { %2040 = vcosq.f32 %v1686_v27  ;;  %v1280_v5 = vor.u32 %v1279_v41, %v1278_v14  ;;  %v1281_v47 = vshll.u32 %v2096_v0, %v1266_v34  ;;  %v1282_v58 = vshrl.u32 %v2097_v6, %v1267_v17 }
 0x1b3   :  { %2042 = vsinq.f32 %v1686_v27  ;;  %v1875_v16 = vadd.s32 4294967294, %v870_v3  ;;  %v891_v43 = vsel %vm3301_vm5, 0, %v3312_v13  ;;  %vm1285_vm8 = vcmp.lt.s32.totalorder %v3293_v19, 2 }
 0x1b4   :  { %vm1286_vm9 = vcmp.lt.s32.totalorder %v3293_v19, 3  ;;  %vm1287_vm11 = vcmp.lt.s32.totalorder %v3293_v19, 4  ;;  %v1283_v59 = vor.u32 %v1282_v58, %v1281_v47  ;;  %v1288_v56 = vsel %vm1284_vm7, %v1268_v54, %v1271_v53 }
 0x1b5   :  { %vm1876_vm10 = vcmp.lt.s32.totalorder %v1875_v16, 0  ;;  %v1289_v15 = vsel %vm1287_vm11, %v1277_v30, 2102212464  ;;  %v1292_v34 = vsel %vm1284_vm7, %v1271_v53, %v1274_v62  ;;  %v1293_v35 = vsel %vm1287_vm11, %v1280_v5, 920167782 }
 0x1b6   :  { %v873_v48 = vsel %vm1876_vm10, 0, %v1875_v16  ;;  %v1290_v25 = vsel %vm1286_vm9, %v1274_v62, %v1289_v15  ;;  %v1296_v13 = vsel %vm1284_vm7, %v1274_v62, %v1277_v30  ;;  %v1294_v20 = vsel %vm1286_vm9, %v1277_v30, %v1293_v35 }
 0x1b7   :  { %v874_v7 = vsub.s32 32, %v873_v48  ;;  %v875_v17 = vshll.u32 %v866_v28, %v873_v48  ;;  %v878_v52 = vsub.s32 4294967266, %v873_v48  ;;  %v1291_v23 = vsel %vm1285_vm8, %v1288_v56, %v1290_v25 }
 0x1b8   :  { %v1297_v37 = vsel %vm1287_vm11, %v1283_v59, 1326507024  ;;  %v1714_v33 = vsel %vm1713_vm6, %v3289_v26, 0  ;;  %v1295_v28 = vsel %vm1285_vm8, %v1292_v34, %v1294_v20  ;;  %vm1690_vm12 = vweird.f32 %v3049_v44 }
 0x1b9   :  { %v876_v63 = vshrl.u32 %v858_v11, %v874_v7  ;;  %v879_v31 = vadd.s32 127, %v878_v52  ;;  %v1298_v8 = vsel %vm1286_vm9, %v1280_v5, %v1297_v37  ;;  %v3368_v41 = vshrl.u32 %v1714_v33, 5 }
 0x1ba   :  { %v1299_v29 = vsel %vm1285_vm8, %v1296_v13, %v1298_v8  ;;  %v3364_v46 = vmul.u32.u64.low %v3308_v55, %v1295_v28  ;;  %v3365_v14 = vmul.u32.u64.high %v3308_v55, %v1295_v28, %v3364_v46  ;;  %vm1693_vm13 = vcmp.lt.s32.totalorder %v3297_v10, 2 }
 0x1bb   :  { %v877_v27 = vor.u32 %v876_v63, %v875_v17  ;;  %v880_v26 = vshll.u32 %v879_v31, 23  ;;  %v3371_v11 = vmul.u32.u64.low %v3308_v55, %v1299_v29  ;;  %v3372_v3 = vmul.u32.u64.high %v3308_v55, %v1299_v29, %v3371_v11 }
 0x1bc   :  { %vm1694_vm14 = vcmp.eq.s32.totalorder %v3297_v10, 0  ;;  %v1716_v19 = vand.u32 31, %v1714_v33  ;;  %vm1697_vm15 = vcmp.eq.s32.totalorder %v3297_v10, 2  ;;  %v3378_v53 = vadd.s32 3, %v891_v43 }
 0x1bd   :  { %v881_v54 = vor.u32 4788187, %v880_v26  ;;  %v1710_v62 = vor.u32 8388608, %v3316_v9  ;;  %v884_v30 = vcvt.s32.f32 %v877_v27  ;;  %v1307_v5 = vmul.u32 %v3308_v55, %v1291_v23 }
 0x1be   :  { %v1310_v16 = vadd.s32 1, %v3365_v14  ;;  %v1717_v47 = vsub.s32 32, %v1716_v19  ;;  %vm1309_vm0 = vc.u32 %v3372_v3, %v3364_v46  ;;  %v1719_v56 = vshll.u32 %v2095_v60, %v1716_v19 }
 0x1bf   :  { %v2041_v58 = vpop.eup %2040  ;;  %v882_v59 = vand.u32 2147483647, %v881_v54  ;;  %v1722_v15 = vshll.u32 %v2092_v49, %v1716_v19  ;;  %vm1734_vm1 = vcmp.lt.s32.totalorder %v3368_v41, 1  ;;  %v1725_v25 = vshll.u32 %v2093_v51, %v1716_v19 }
 0x1c0   :  { %v2043_v43 = vpop.eup %2042  ;;  %v1698_v48 = vxor.u32 2147483648, %v2041_v58  ;;  %v1311_v9 = vsel %vm1309_vm0, %v1310_v16, %v3365_v14  ;;  %v1720_v55 = vshrl.u32 %v2092_v49, %v1717_v47  ;;  %v1723_v17 = vshrl.u32 %v2093_v51, %v1717_v47 }
 0x1c1   :  { %v1695_v34 = vxor.u32 2147483648, %v2043_v43  ;;  %v885_v35 = vmul.f32 %v884_v30, %v882_v59  ;;  %v1312_v7 = vadd.s32 %v1311_v9, %v1307_v5  ;;  %vm1735_vm2 = vcmp.lt.s32.totalorder %v3368_v41, 2 }
 0x1c2   :  { %v1699_v52 = vsel %vm1697_vm15, %v1698_v48, %v2043_v43  ;;  %v1721_v13 = vor.u32 %v1720_v55, %v1719_v56  ;;  %v1726_v23 = vshrl.u32 %v2094_v57, %v1717_v47  ;;  %v1728_v20 = vshll.u32 %v2094_v57, %v1716_v19 }
 0x1c3   :  { %v1696_v37 = vsel %vm1694_vm14, %v2041_v58, %v1695_v34  ;;  %v886_v33 = vxor.u32 2147483648, %v885_v35  ;;  %v1313_v63 = vadd.s32 536870912, %v1312_v7  ;;  %v1724_v31 = vor.u32 %v1723_v17, %v1722_v15 }
 0x1c4   :  { %v1700_v28 = vsel %vm1693_vm13, %v1696_v37, %v1699_v52  ;;  %v1727_v8 = vor.u32 %v1726_v23, %v1725_v25  ;;  %v1729_v29 = vshrl.u32 %v2096_v0, %v1717_v47  ;;  %v1731_v14 = vshll.u32 %v2096_v0, %v1716_v19  ;;  %v2064_v25 = vld [vmem:[%s3719_s1] sm:$0xff] }
 0x1c5   :  { %vm70_vm4 = vcmp.lt.s32.totalorder %v3244_v4, 4  ;;  %v1701_v27 = vsel %vm1690_vm12, nan, %v1700_v28  ;;  %v887_v26 = vsel %vm804_vm3, %v886_v33, %v885_v35  ;;  %v3408_v11 = vshrl.u32 %v1313_v63, 30 }
 0x1c6   :  { %v1732_v54 = vshrl.u32 %v2097_v6, %v1717_v47  ;;  %1808 = vrot.lane.b32.xlu0 %v1701_v27, %s2104_s20  ;;  %v890_v10 = vsel %vm3301_vm5, %v3090_v45, %v887_v26  ;;  %v1718_v19 = vshrl.u32 %v2095_v60, %v1717_v47  ;;  %v1730_v30 = vor.u32 %v1729_v29, %v1728_v20 }
 0x1c7   :  { %vm1737_vm6 = vcmp.lt.s32.totalorder %v3368_v41, 4  ;;  %2044 = vcosq.f32 %v890_v10  ;;  %v1315_v44 = vshll.u32 %v3408_v11, 30  ;;  %vm1736_vm3 = vcmp.lt.s32.totalorder %v3368_v41, 3 }
 0x1c8   :  { %v1733_v5 = vor.u32 %v1732_v54, %v1731_v14  ;;  %v1739_v16 = vsel %vm1737_vm6, %v1727_v8, 2102212464  ;;  %2046 = vsinq.f32 %v890_v10  ;;  %v1742_v58 = vsel %vm1734_vm1, %v1721_v13, %v1724_v31 }
 0x1c9   :  { %v1743_v50 = vsel %vm1737_vm6, %v1730_v30, 920167782  ;;  %v3425_v47 = vsub.s32 %v1312_v7, %v1315_v44  ;;  %v1738_v59 = vsel %vm1734_vm1, %v1718_v19, %v1721_v13  ;;  %v1750_v15 = vshll.u32 %v1710_v62, 8 }
 0x1ca   :  { %v1744_v56 = vsel %vm1736_vm3, %v1727_v8, %v1743_v50  ;;  %v1740_v43 = vsel %vm1736_vm3, %v1724_v31, %v1739_v16  ;;  %v1746_v9 = vsel %vm1734_vm1, %v1724_v31, %v1727_v8  ;;  %v1747_v55 = vsel %vm1737_vm6, %v1733_v5, 1326507024  ;;  %1819 = vrot.lane.b32.xlu0 %v2064_v25, %s2105_s23 }
 0x1cb   :  { %v1745_v48 = vsel %vm1735_vm2, %v1742_v58, %v1744_v56  ;;  %v3444_v62 = vsub.s32 32, %v3247_v2  ;;  %v896_v34 = vand.u32 3, %v3378_v53  ;;  %v1318_v35 = vsub.s32 0, %v3425_v47 }
 0x1cc   :  { %v1748_v7 = vsel %vm1736_vm3, %v1730_v30, %v1747_v55  ;;  %v3452_v52 = vmul.u32.u64.low %v1750_v15, %v1745_v48  ;;  %v3453_v13 = vmul.u32.u64.high %v1750_v15, %v1745_v48, %v3452_v52  ;;  %v35_v23 = vand.u32 2147483647, %v2139_v12 }
 0x1cd   :  { %v1749_v17 = vsel %vm1735_vm2, %v1746_v9, %v1748_v7  ;;  %v1890_v20 = vmin.u32 %v1318_v35, %v3425_v47  ;;  %v1741_v37 = vsel %vm1735_vm2, %v1738_v59, %v1740_v43  ;;  %v76_v63 = vsel %vm70_vm4, %v3251_v39, 920167782 }
 0x1ce   :  { %v3460_v53 = vmul.u32.u64.low %v1750_v15, %v1749_v17  ;;  %v3461_v33 = vmul.u32.u64.high %v1750_v15, %v1749_v17, %v3460_v53  ;;  %v80_v31 = vsel %vm70_vm4, %v66_v36, 1326507024  ;;  %v3473_v28 = vshrl.u32 %v2097_v6, %v3444_v62 }
 0x1cf   :  { %vm898_vm5 = vcmp.eq.s32.totalorder %v896_v34, 0  ;;  %vm901_vm7 = vcmp.eq.s32.totalorder %v896_v34, 2  ;;  %v1320_v41 = vclz %v1890_v20  ;;  %vm897_vm8 = vcmp.lt.s32.totalorder %v896_v34, 2 }
 0x1d0   :  { %v1757_v8 = vmul.u32 %v1750_v15, %v1741_v37  ;;  %v1760_v29 = vadd.s32 1, %v3453_v13  ;;  %v42_v14 = vand.u32 8388607, %v35_v23  ;;  %v53_v32 = vshrl.u32 %v2092_v49, %v2719_v21 }
 0x1d1   :  { %vm894_vm9 = vweird.f32 %v3090_v45  ;;  %v1891_v38 = vadd.s32 4294967294, %v1320_v41  ;;  %vm1759_vm11 = vc.u32 %v3461_v33, %v3452_v52  ;;  %v52_v6 = vshll.u32 %v2095_v60, %v2609_v24 }
 0x1d2   :  { %v56_v36 = vshrl.u32 %v2093_v51, %v2719_v21  ;;  %v1761_v27 = vsel %vm1759_vm11, %v1760_v29, %v3453_v13  ;;  %v55_v26 = vshll.u32 %v2092_v49, %v2609_v24  ;;  %v58_v54 = vshll.u32 %v2093_v51, %v2609_v24 }
 0x1d3   :  { %v59_v10 = vshrl.u32 %v2094_v57, %v2719_v21  ;;  %v1308_v19 = vadd.s32 %v3364_v46, %v3372_v3  ;;  %vm1892_vm10 = vcmp.lt.s32.totalorder %v1891_v38, 0  ;;  %v1762_v30 = vadd.s32 %v1761_v27, %v1757_v8 }
 0x1d4   :  { %v51_v44 = vshrl.u32 %v2095_v60, %v2719_v21  ;;  %v2045_v5 = vpop.eup %2044  ;;  %v1323_v16 = vsel %vm1892_vm10, 0, %v1891_v38  ;;  %v54_v58 = vor.u32 %v53_v32, %v52_v6  ;;  %v57_v50 = vor.u32 %v56_v36, %v55_v26 }
 0x1d5   :  { %v60_v59 = vor.u32 %v59_v10, %v58_v54  ;;  %v2047_v56 = vpop.eup %2046  ;;  %v902_v15 = vxor.u32 2147483648, %v2045_v5  ;;  %v1324_v43 = vsub.s32 32, %v1323_v16  ;;  %v1328_v24 = vsub.s32 4294967266, %v1323_v16 }
 0x1d6   :  { %v43_v48 = vor.u32 8388608, %v42_v14  ;;  %v899_v9 = vxor.u32 2147483648, %v2047_v56  ;;  %v1763_v55 = vadd.s32 536870912, %v1762_v30  ;;  %vm67_vm12 = vcmp.lt.s32.totalorder %v3244_v4, 1 }
 0x1d7   :  { %vm69_vm13 = vcmp.lt.s32.totalorder %v3244_v4, 3  ;;  %v903_v46 = vsel %vm901_vm7, %v902_v15, %v2047_v56  ;;  %v1325_v21 = vshll.u32 %v3425_v47, %v1323_v16  ;;  %v1326_v3 = vshrl.u32 %v1308_v19, %v1324_v43 }
 0x1d8   :  { %v1329_v25 = vadd.s32 127, %v1328_v24  ;;  %v900_v35 = vsel %vm898_vm5, %v2045_v5, %v899_v9  ;;  %v3503_v7 = vshrl.u32 %v1763_v55, 30  ;;  %v75_v17 = vsel %vm67_vm12, %v54_v58, %v57_v50 }
 0x1d9   :  { %v77_v13 = vsel %vm69_vm13, %v60_v59, %v76_v63  ;;  %v904_v20 = vsel %vm897_vm8, %v900_v35, %v903_v46  ;;  %v1327_v37 = vor.u32 %v1326_v3, %v1325_v21  ;;  %vm68_vm14 = vcmp.lt.s32.totalorder %v3244_v4, 2 }
 0x1da   :  { %v1330_v53 = vshll.u32 %v1329_v25, 23  ;;  %v905_v47 = vsel %vm894_vm9, nan, %v904_v20  ;;  %v1765_v41 = vshll.u32 %v3503_v7, 30  ;;  %v72_v8 = vsel %vm70_vm4, %v60_v59, 2102212464 }
 0x1db   :  { %v79_v29 = vsel %vm67_vm12, %v57_v50, %v60_v59  ;;  %910 = vrot.lane.b32.xlu1 %v905_v47, %s2101_s17  ;;  %v78_v34 = vsel %vm68_vm14, %v75_v17, %v77_v13  ;;  %v81_v14 = vsel %vm69_vm13, %v3251_v39, %v80_v31  ;;  %v83_v45 = vshll.u32 %v43_v48, 8 }
 0x1dc   :  { %v1331_v63 = vor.u32 4788187, %v1330_v53  ;;  %v1338_v32 = vsub.s32 4, %v3408_v11  ;;  %v1766_v38 = vsub.s32 %v1762_v30, %v1765_v41  ;;  %v71_v6 = vsel %vm67_vm12, %v51_v44, %v54_v58 }
 0x1dd   :  { %v82_v36 = vsel %vm68_vm14, %v79_v29, %v81_v14  ;;  %v1334_v26 = vcvt.s32.f32 %v1327_v37  ;;  %v73_v5 = vsel %vm69_vm13, %v57_v50, %v72_v8  ;;  %v3539_v30 = vshrl.u32 %v3008_v1, 5 }
 0x1de   :  { %v1332_v27 = vand.u32 2147483647, %v1331_v63  ;;  %v3529_v54 = vmul.u32.u64.low %v83_v45, %v82_v36  ;;  %v3530_v10 = vmul.u32.u64.high %v83_v45, %v82_v36, %v3529_v54  ;;  %v1768_v19 = vsub.s32 0, %v1766_v38 }
 0x1df   :  { %v3534_v39 = vmul.u32.u64.low %v83_v45, %v78_v34  ;;  %v3535_v31 = vmul.u32.u64.high %v83_v45, %v78_v34, %v3534_v39  ;;  %v168_v44 = vshll.u32 %v2096_v0, %v3247_v2  ;;  %vm1254_vm15 = vcmp.lt.s32.totalorder %v3209_v42, 0 }
 0x1e0   :  { %v1335_v16 = vmul.f32 %v1334_v26, %v1332_v27  ;;  %v1339_v58 = vsel %vm1254_vm15, %v1338_v32, %v3408_v11  ;;  %v1906_v59 = vmin.u32 %v1768_v19, %v1766_v38  ;;  %v166_v56 = vshrl.u32 %v2096_v0, %v3444_v62 }
 0x1e1   :  { %v170_v50 = vor.u32 %v3473_v28, %v168_v44  ;;  %v74_v43 = vsel %vm68_vm14, %v71_v6, %v73_v5  ;;  %v165_v1 = vshll.u32 %v2094_v57, %v3247_v2  ;;  %vm3554_vm0 = vcmp.le.f32.partialorder %v1252_v61, 0.7853982 }
 0x1e2   :  { %v1336_v15 = vxor.u32 2147483648, %v1335_v16  ;;  %v1770_v11 = vclz %v1906_v59  ;;  %vm92_vm1 = vc.u32 %v3530_v10, %v3534_v39  ;;  %vm174_vm2 = vcmp.lt.s32.totalorder %v3539_v30, 4 }
 0x1e3   :  { %v1341_v4 = vsel %vm3554_vm0, 0, %v1339_v58  ;;  %v93_v28 = vadd.s32 1, %v3535_v31  ;;  %v90_v9 = vmul.u32 %v83_v45, %v74_v43  ;;  %v139_v55 = vand.u32 2147483647, %v2146_v18 }
 0x1e4   :  { %v1337_v0 = vsel %vm1254_vm15, %v1336_v15, %v1335_v16  ;;  %v1907_v61 = vadd.s32 4294967294, %v1770_v11  ;;  %v167_v46 = vor.u32 %v166_v56, %v165_v1  ;;  %v184_v21 = vsel %vm174_vm2, %v170_v50, 1326507024 }
 0x1e5   :  { %v1340_v48 = vsel %vm3554_vm0, %v3209_v42, %v1337_v0  ;;  %v94_v3 = vsel %vm92_vm1, %v93_v28, %v3535_v31  ;;  %v1345_v25 = vadd.s32 3, %v1341_v4  ;;  %v1758_v17 = vadd.s32 %v3452_v52, %v3461_v33 }
 0x1e6   :  { %2048 = vcosq.f32 %v1340_v48  ;;  %vm1908_vm4 = vcmp.lt.s32.totalorder %v1907_v61, 0  ;;  %v95_v35 = vadd.s32 %v94_v3, %v90_v9  ;;  %v159_v20 = vshll.u32 %v2092_v49, %v3247_v2 }
 0x1e7   :  { %2050 = vsinq.f32 %v1340_v48  ;;  %v1773_v13 = vsel %vm1908_vm4, 0, %v1907_v61  ;;  %v160_v37 = vshrl.u32 %v2093_v51, %v3444_v62  ;;  %v146_v8 = vand.u32 8388607, %v139_v55 }
 0x1e8   :  { %v1774_v53 = vsub.s32 32, %v1773_v13  ;;  %v1778_v47 = vsub.s32 4294967266, %v1773_v13  ;;  %v96_v41 = vadd.s32 536870912, %v95_v35  ;;  %v157_v29 = vshrl.u32 %v2092_v49, %v3444_v62 }
 0x1e9   :  { %v161_v63 = vor.u32 %v160_v37, %v159_v20  ;;  %v162_v52 = vshll.u32 %v2093_v51, %v3247_v2  ;;  %v163_v33 = vshrl.u32 %v2094_v57, %v3444_v62  ;;  %v1775_v34 = vshll.u32 %v1766_v38, %v1773_v13 }
 0x1ea   :  { %v1776_v14 = vshrl.u32 %v1758_v17, %v1774_v53  ;;  %v1779_v45 = vadd.s32 127, %v1778_v47  ;;  %v3585_v32 = vshrl.u32 %v96_v41, 30  ;;  %v1346_v6 = vand.u32 3, %v1345_v25 }
 0x1eb   :  { %v156_v36 = vshll.u32 %v2095_v60, %v3247_v2  ;;  %v164_v27 = vor.u32 %v163_v33, %v162_v52  ;;  %vm171_vm6 = vcmp.lt.s32.totalorder %v3539_v30, 1  ;;  %vm173_vm3 = vcmp.lt.s32.totalorder %v3539_v30, 3 }
 0x1ec   :  { %v1777_v49 = vor.u32 %v1776_v14, %v1775_v34  ;;  %v1780_v26 = vshll.u32 %v1779_v45, 23  ;;  %v98_v54 = vshll.u32 %v3585_v32, 30  ;;  %v147_v51 = vor.u32 8388608, %v146_v8 }
 0x1ed   :  { %v158_v57 = vor.u32 %v157_v29, %v156_v36  ;;  %v183_v38 = vsel %vm171_vm6, %v161_v63, %v164_v27  ;;  %v185_v19 = vsel %vm173_vm3, %v167_v46, %v184_v21  ;;  %v180_v2 = vsel %vm174_vm2, %v167_v46, 920167782 }
 0x1ee   :  { %v1781_v5 = vor.u32 4788187, %v1780_v26  ;;  %v99_v31 = vsub.s32 %v95_v35, %v98_v54  ;;  %vm1344_vm5 = vweird.f32 %v3209_v42  ;;  %vm3601_vm7 = vcmp.le.f32.partialorder %v1702_v22, 0.7853982 }
 0x1ef   :  { %vm1704_vm8 = vcmp.lt.s32.totalorder %v3214_v40, 0  ;;  %vm172_vm9 = vcmp.lt.s32.totalorder %v3539_v30, 2  ;;  %v1784_v58 = vcvt.s32.f32 %v1777_v49  ;;  %vm1351_vm11 = vcmp.eq.s32.totalorder %v1346_v6, 2 }
 0x1f0   :  { %v1782_v16 = vand.u32 2147483647, %v1781_v5  ;;  %v101_v59 = vsub.s32 0, %v99_v31  ;;  %v186_v56 = vsel %vm172_vm9, %v183_v38, %v185_v19  ;;  %v179_v50 = vsel %vm171_vm6, %v158_v57, %v161_v63 }
 0x1f1   :  { %v181_v22 = vsel %vm173_vm3, %v164_v27, %v180_v2  ;;  %v187_v15 = vshll.u32 %v147_v51, 8  ;;  %v1788_v24 = vsub.s32 4, %v3503_v7  ;;  %v155_v0 = vshrl.u32 %v2095_v60, %v3444_v62 }
 0x1f2   :  { %v1785_v1 = vmul.f32 %v1784_v58, %v1782_v16  ;;  %v1846_v11 = vmin.u32 %v101_v59, %v99_v31  ;;  %v176_v48 = vsel %vm174_vm2, %v164_v27, 2102212464  ;;  %v182_v25 = vsel %vm172_vm9, %v179_v50, %v181_v22 }
 0x1f3   :  { %v2049_v43 = vpop.eup %2048  ;;  %v3618_v61 = vmul.u32.u64.low %v187_v15, %v186_v56  ;;  %v3619_v9 = vmul.u32.u64.high %v187_v15, %v186_v56, %v3618_v61  ;;  %vm1347_vm10 = vcmp.lt.s32.totalorder %v1346_v6, 2  ;;  %vm1348_vm12 = vcmp.eq.s32.totalorder %v1346_v6, 0 }
 0x1f4   :  { %v2051_v4 = vpop.eup %2050  ;;  %v1352_v28 = vxor.u32 2147483648, %v2049_v43  ;;  %v1786_v21 = vxor.u32 2147483648, %v1785_v1  ;;  %v103_v3 = vclz %v1846_v11  ;;  %v175_v60 = vsel %vm171_vm6, %v155_v0, %v158_v57 }
 0x1f5   :  { %v1349_v46 = vxor.u32 2147483648, %v2051_v4  ;;  %v177_v20 = vsel %vm173_vm3, %v161_v63, %v176_v48  ;;  %v3633_v47 = vmul.u32.u64.low %v187_v15, %v182_v25  ;;  %v3634_v41 = vmul.u32.u64.high %v187_v15, %v182_v25, %v3633_v47 }
 0x1f6   :  { %v1353_v35 = vsel %vm1351_vm11, %v1352_v28, %v2051_v4  ;;  %v1787_v17 = vsel %vm1704_vm8, %v1786_v21, %v1785_v1  ;;  %v1847_v13 = vadd.s32 4294967294, %v103_v3  ;;  %v1789_v29 = vsel %vm1704_vm8, %v1788_v24, %v3503_v7  ;;  %v688_v4 = vpop.permute.xlu0 %687  ;;  %v3670_v28 = vpop.permute.xlu1 %689 }
 0x1f7   :  { %v1350_v62 = vsel %vm1348_vm12, %v2049_v43, %v1349_v46  ;;  %v1790_v53 = vsel %vm3601_vm7, %v3214_v40, %v1787_v17  ;;  %v178_v52 = vsel %vm172_vm9, %v175_v60, %v177_v20  ;;  %v91_v33 = vadd.s32 %v3534_v39, %v3530_v10 }
 0x1f8   :  { %v1354_v37 = vsel %vm1347_vm10, %v1350_v62, %v1353_v35  ;;  %2052 = vcosq.f32 %v1790_v53  ;;  %vm1848_vm13 = vcmp.lt.s32.totalorder %v1847_v13, 0  ;;  %vm196_vm14 = vc.u32 %v3619_v9, %v3633_v47  ;;  %v2065_v35 = vld [vmem:[%s3719_s1 + $0x8] sm:$0xff]  ;;  %s2106_s1 = smov [#allocation2]  }
 0x1f9   :  { %v1355_v8 = vsel %vm1344_vm5, nan, %v1354_v37  ;;  %2054 = vsinq.f32 %v1790_v53  ;;  %v106_v63 = vsel %vm1848_vm13, 0, %v1847_v13  ;;  %v1791_v42 = vsel %vm3601_vm7, 0, %v1789_v29  ;;  %s1833_s26 = sshll.u32 %s2106_s1, 4  ;;  %s1834_s26 = int_to_ptr.vmem [resolvable:$true] %s1833_s26 }
 0x1fa   :  { %1360 = vrot.lane.b32.xlu1 %v1355_v8, %s2103_s19  ;;  %v107_v34 = vsub.s32 32, %v106_v63  ;;  %v111_v14 = vsub.s32 4294967266, %v106_v63  ;;  %v197_v7 = vadd.s32 1, %v3634_v41  ;;  %v108_v45 = vshll.u32 %v99_v31, %v106_v63  ;;  %v1138_v3 = vpop.permute.xlu0 %1137  ;;  %v3682_v60 = vpop.permute.xlu1 %1139  ;;  %s2066_s27 = scalar_lea.vmem %s1834_s26, 256  ;;  %p2071_p1 = scmp.lt.s32.totalorder %s1834_s26, %s1834_s26 }
 0x1fb   :  { %v194_v27 = vmul.u32 %v187_v15, %v178_v52  ;;  %v1795_v10 = vadd.s32 3, %v1791_v42  ;;  %vm37_vm15 = vcmp.lt.s32.totalorder %v2139_v12, 0  ;;  %vm3659_vm1 = vcmp.le.f32.partialorder %v35_v23, 0.7853982  ;;  %p2067_p0 = scmp.ne.s32.totalorder %s1834_s26, %s2066_s27  ;;  %p2072_p2 = scmp.lt.s32.totalorder %s2066_s27, %s2066_s27 }
 0x1fc   :  { %v109_v6 = vshrl.u32 %v91_v33, %v107_v34  ;;  %v112_v36 = vadd.s32 127, %v111_v14  ;;  %v198_v30 = vsel %vm196_vm14, %v197_v7, %v3634_v41  ;;  %v121_v15 = vsub.s32 4, %v3585_v32 }
 0x1fd   :  { %v199_v54 = vadd.s32 %v198_v30, %v194_v27  ;;  %v1796_v2 = vand.u32 3, %v1795_v10  ;;  %vm1794_vm6 = vweird.f32 %v3214_v40  ;;  %v195_v17 = vadd.s32 %v3633_v47, %v3619_v9  ;;  %p2073_p3 = por %p2072_p2, %p2071_p1 }
 0x1fe   :  { %v110_v49 = vor.u32 %v109_v6, %v108_v45  ;;  %v113_v26 = vshll.u32 %v112_v36, 23  ;;  %v122_v46 = vsel %vm37_vm15, %v121_v15, %v3585_v32  ;;  %v1588_v37 = vpop.permute.xlu0 %1587  ;;  %v3686_v63 = vpop.permute.xlu1 %1589  ;;  %vm243_vm9 = vcmask 48128  }
 0x1ff   :  { %v200_v51 = vadd.s32 536870912, %v199_v54  ;;  %vm1801_vm0 = vcmp.eq.s32.totalorder %v1796_v2, 2  ;;  %vm1798_vm2 = vcmp.eq.s32.totalorder %v1796_v2, 0  ;;  %vm1797_vm4 = vcmp.lt.s32.totalorder %v1796_v2, 2  ;;  %p2074_p4 = pnand %p2073_p3, %p2067_p0 }
 0x200   :  { %v114_v39 = vor.u32 4788187, %v113_v26  ;;  %v117_v38 = vcvt.s32.f32 %v110_v49  ;;  %v124_v25 = vsel %vm3659_vm1, 0, %v122_v46  ;;  %vm127_vm11 = vweird.f32 %v2139_v12 }
 0x201   :  { %v3653_v19 = vshrl.u32 %v200_v51, 30  ;;  %v128_v62 = vadd.s32 3, %v124_v25  ;;  %vm464_vm10 = vcmask 244928   ;;  %vm693_vm12 = vcmask 97328  }
 0x202   :  { %v115_v57 = vand.u32 2147483647, %v114_v39  ;;  %v909_v9 = vpop.permute.xlu0 %908  ;;  %v459_v49 = vpop.permute.xlu1 %458  ;;  %vm914_vm13 = vcmask 294128   ;;  %vm141_vm14 = vcmp.lt.s32.totalorder %v2146_v18, 0 }
 0x203   :  { %v202_v44 = vshll.u32 %v3653_v19, 30  ;;  %v129_v29 = vand.u32 3, %v128_v62  ;;  %v225_v39 = vsub.s32 4, %v3653_v19 }
 0x204   :  { %v118_v5 = vmul.f32 %v117_v38, %v115_v57 }
 0x205   :  { %v2053_v31 = vpop.eup %2052  ;;  %v203_v56 = vsub.s32 %v199_v54, %v202_v44  ;;  %vm134_vm5 = vcmp.eq.s32.totalorder %v129_v29, 2  ;;  %vm131_vm7 = vcmp.eq.s32.totalorder %v129_v29, 0  ;;  %vm130_vm8 = vcmp.lt.s32.totalorder %v129_v29, 2 }
 0x206   :  { %v2055_v16 = vpop.eup %2054  ;;  %v1802_v58 = vxor.u32 2147483648, %v2053_v31  ;;  %v119_v59 = vxor.u32 2147483648, %v118_v5  ;;  %v1359_v51 = vpop.permute.xlu0 %1358  ;;  %v226_v38 = vsel %vm141_vm14, %v225_v39, %v3653_v19 }
 0x207   :  { %v1799_v50 = vxor.u32 2147483648, %v2055_v16  ;;  %v205_v24 = vsub.s32 0, %v203_v56 }
 0x208   :  { %v1803_v43 = vsel %vm1801_vm0, %v1802_v58, %v2055_v16  ;;  %v120_v1 = vsel %vm37_vm15, %v119_v59, %v118_v5  ;;  %vm1143_vm15 = vcmask 146528   ;;  %vm140_vm0 = vcmp.le.f32.partialorder %v139_v55, 0.7853982 }
 0x209   :  { %v1800_v11 = vsel %vm1798_vm2, %v2053_v31, %v1799_v50  ;;  %v123_v0 = vsel %vm3659_vm1, %v2139_v12, %v120_v1  ;;  %v1850_v48 = vmin.u32 %v205_v24, %v203_v56  ;;  %vm1364_vm1 = vcmask 343328  }
 0x20a   :  { %v1804_v23 = vsel %vm1797_vm4, %v1800_v11, %v1803_v43  ;;  %2056 = vcosq.f32 %v123_v0  ;;  %vm1593_vm2 = vcmask 195728   ;;  %v228_v2 = vsel %vm140_vm0, 0, %v226_v38 }
 0x20b   :  { %v1805_v61 = vsel %vm1794_vm6, nan, %v1804_v23  ;;  %2058 = vsinq.f32 %v123_v0  ;;  %v207_v21 = vclz %v1850_v48  ;;  %v232_v55 = vadd.s32 3, %v228_v2 }
 0x20c   :  { %1810 = vrot.lane.b32.xlu1 %v1805_v61, %s2104_s20 }
 0x20d   :  { %v1851_v40 = vadd.s32 4294967294, %v207_v21  ;;  %v233_v5 = vand.u32 3, %v232_v55 }
 0x20f   :  { %vm1852_vm3 = vcmp.lt.s32.totalorder %v1851_v40, 0  ;;  %vm238_vm4 = vcmp.eq.s32.totalorder %v233_v5, 2  ;;  %vm235_vm6 = vcmp.eq.s32.totalorder %v233_v5, 0 }
 0x210   :  { %1821 = vrot.lane.b32.xlu1 %v2065_v35, %s2105_s23  ;;  %v210_v32 = vsel %vm1852_vm3, 0, %v1851_v40  ;;  %vm234_vm3 = vcmp.lt.s32.totalorder %v233_v5, 2 }
 0x211   :  { %v211_v13 = vsub.s32 32, %v210_v32  ;;  %v215_v20 = vsub.s32 4294967266, %v210_v32  ;;  %v212_v53 = vshll.u32 %v203_v56, %v210_v32 }
 0x213   :  { %v213_v41 = vshrl.u32 %v195_v17, %v211_v13  ;;  %v216_v8 = vadd.s32 127, %v215_v20 }
 0x215   :  { %v214_v52 = vor.u32 %v213_v41, %v212_v53  ;;  %v217_v33 = vshll.u32 %v216_v8, 23 }
 0x217   :  { %v2057_v34 = vpop.eup %2056  ;;  %v218_v7 = vor.u32 4788187, %v217_v33  ;;  %v221_v36 = vcvt.s32.f32 %v214_v52 }
 0x218   :  { %v2059_v14 = vpop.eup %2058  ;;  %v135_v42 = vxor.u32 2147483648, %v2057_v34 }
 0x219   :  { %v132_v45 = vxor.u32 2147483648, %v2059_v14  ;;  %v219_v47 = vand.u32 2147483647, %v218_v7 }
 0x21a   :  { %v136_v6 = vsel %vm134_vm5, %v135_v42, %v2059_v14  ;;  %vm231_vm5 = vweird.f32 %v2146_v18 }
 0x21b   :  { %v133_v27 = vsel %vm131_vm7, %v2057_v34, %v132_v45  ;;  %v222_v26 = vmul.f32 %v221_v36, %v219_v47  ;;  %vm1814_vm7 = vcmask 392528  }
 0x21c   :  { %v137_v30 = vsel %vm130_vm8, %v133_v27, %v136_v6  ;;  %vm1825_vm8 = vcmask 425344  }
 0x21d   :  { %v138_v54 = vsel %vm127_vm11, nan, %v137_v30  ;;  %v223_v10 = vxor.u32 2147483648, %v222_v26  ;;  %v461_v50 = vpop.permute.xlu1 %460 }
 0x21e   :  { %244 = vst.msk [vmem:[#allocation2] sm:$0xff] %vm243_vm9, %v138_v54 }
 0x21f   :  { %465 = vst.msk [vmem:[#allocation2] sm:$0xff] %vm464_vm10, %v459_v49  ;;  %v224_v12 = vsel %vm141_vm14, %v223_v10, %v222_v26 }
 0x220   :  { %694 = vst.msk [vmem:[#allocation2] sm:$0xff] %vm693_vm12, %v688_v4  ;;  %v227_v57 = vsel %vm140_vm0, %v2146_v18, %v224_v12 }
 0x221   :  { %915 = vst.msk [vmem:[#allocation2] sm:$0xff] %vm914_vm13, %v909_v9  ;;  %2060 = vcosq.f32 %v227_v57 }
 0x222   :  { %1144 = vst.msk [vmem:[#allocation2] sm:$0xff] %vm1143_vm15, %v1138_v3  ;;  %2062 = vsinq.f32 %v227_v57 }
 0x223   :  { %1365 = vst.msk [vmem:[#allocation2] sm:$0xff] %vm1364_vm1, %v1359_v51 }
 0x224   :  { %1594 = vst.msk [vmem:[#allocation2] sm:$0xff] %vm1593_vm2, %v1588_v37 }
 0x22e   :  { %v2061_v44 = vpop.eup %2060 }
 0x22f   :  { %v2063_v31 = vpop.eup %2062  ;;  %v239_v16 = vxor.u32 2147483648, %v2061_v44 }
 0x230   :  { %v236_v58 = vxor.u32 2147483648, %v2063_v31 }
 0x231   :  { %v240_v59 = vsel %vm238_vm4, %v239_v16, %v2063_v31 }
 0x232   :  { %v237_v56 = vsel %vm235_vm6, %v2061_v44, %v236_v58 }
 0x233   :  { %v241_v19 = vsel %vm234_vm3, %v237_v56, %v240_v59 }
 0x234   :  { %v242_v22 = vsel %vm231_vm5, nan, %v241_v19 }
 0x235   :  { %245 = vst.msk [vmem:[#allocation2 + $0x8] sm:$0xff] %vm243_vm9, %v242_v22 }
 0x236   :  { %466 = vst.msk [vmem:[#allocation2 + $0x8] sm:$0xff] %vm464_vm10, %v461_v50 }
 0x237   :  { %695 = vst.msk [vmem:[#allocation2 + $0x8] sm:$0xff] %vm693_vm12, %v3670_v28 }
 0x238   :  { %v1809_v15 = vpop.permute.xlu0 %1808 }
 0x239   :  { %1815 = vst.msk [vmem:[#allocation2] sm:$0xff] %vm1814_vm7, %v1809_v15 }
 0x23c   :  { %v1820_v43 = vpop.permute.xlu0 %1819 }
 0x23d   :  { %1826 = vst.msk [vmem:[#allocation2] sm:$0xff] %vm1825_vm8, %v1820_v43 }
 0x24d   :  { %v911_v1 = vpop.permute.xlu1 %910 }
 0x24e   :  { %916 = vst.msk [vmem:[#allocation2 + $0x8] sm:$0xff] %vm914_vm13, %v911_v1 }
 0x24f   :  { %1145 = vst.msk [vmem:[#allocation2 + $0x8] sm:$0xff] %vm1143_vm15, %v3682_v60 }
 0x26c   :  { %v1361_v18 = vpop.permute.xlu1 %1360 }
 0x26d   :  { %1366 = vst.msk [vmem:[#allocation2 + $0x8] sm:$0xff] %vm1364_vm1, %v1361_v18 }
 0x26e   :  { %1595 = vst.msk [vmem:[#allocation2 + $0x8] sm:$0xff] %vm1593_vm2, %v3686_v63 }
 0x27e   :  { %v1811_v24 = vpop.permute.xlu1 %1810 }
 0x27f   :  { %1816 = vst.msk [vmem:[#allocation2 + $0x8] sm:$0xff] %vm1814_vm7, %v1811_v24 }
 0x282   :  { %v1822_v11 = vpop.permute.xlu1 %1821 }
 0x283   :  { %1827 = vst.msk [vmem:[#allocation2 + $0x8] sm:$0xff] %vm1825_vm8, %v1822_v11 }
 0x284   :  { %2077 = shalt.err (!%p2074_p4)
}
 0x285   :  { %s2107_s28 = smov 128   ;;  %s2108_s29 = smov 8  }
 0x286   :  { %1839 = dma.vmem_to_hbm [thread:$0]  %s1834_s26, 256, %s3720_s2, [#allocation3], %s2107_s28, %s2107_s28, %s2108_s29  }
 0x287   :  { %2086 = dma.done.wait [#allocation3], 256  }
 0x288   :  { %2087 = vsyncadd [#allocation3], 4294967040 }
 0x289   :  { %1843 = vsyncpa [#allocation3], 1 }

</bundles_post_ra>
